<compile_context>
chip_gen: v5e
topology: v5e:2x2
jax: 0.10.0
libtpu: 0.0.40
codegen_flags: <defaults>
</compile_context>

<pallas_src>
import jax
import jax.numpy as jnp
from jax import lax
from jax.experimental import pallas as pl
from jax.experimental.pallas import tpu as pltpu


def _round_up(x, m):
    return (x + m - 1) // m * m


def _pad2(a, shape):
    out = jnp.zeros(shape, a.dtype)
    return out.at[: a.shape[0], : a.shape[1]].set(a)


def _pad_last(a, n):
    pad = n - a.shape[-1]
    if pad == 0:
        return a
    return jnp.pad(a, [(0, 0)] * (a.ndim - 1) + [(0, pad)])


def _make_kernel(num_layer, T, TB, Hp, cdt):
    unroll = True if T <= 32 else 8

    def kernel(*refs):
        # refs = proj0, lengths, w_hh0, [w_ih, w_hh, b] * (L-1), fc_w, fc_b,
        #        out, [proj, seq] (scratch, only if L > 1)
        idx = 0
        proj0_ref = refs[idx]; idx += 1            # (T*TB, Hp) bf16
        len_ref = refs[idx]; idx += 1              # (TB, 1) i32
        whh_refs = [None] * num_layer
        wih_refs = [None] * num_layer
        b_refs = [None] * num_layer
        whh_refs[0] = refs[idx]; idx += 1
        for l in range(1, num_layer):
            wih_refs[l] = refs[idx]; idx += 1
            whh_refs[l] = refs[idx]; idx += 1
            b_refs[l] = refs[idx]; idx += 1
        fcw_ref = refs[idx]; idx += 1              # (Hp, OUTP) bf16
        fcb_ref = refs[idx]; idx += 1              # (1, OUTP) f32
        out_ref = refs[idx]; idx += 1              # (TB, OUTP) f32
        if num_layer > 1:
            proj_ref = refs[idx]; idx += 1         # (T*TB, Hp) bf16
            seq_ref = refs[idx]; idx += 1          # (T*TB, Hp) bf16

        # Last valid timestep per row; length==0 wraps to T-1 (matches torch
        # negative indexing of int(sum(mask)) - 1 == -1).
        lengths = len_ref[...]                                      # (TB,1) i32
        last_t = jnp.where(lengths <= 0, T - 1, lengths - 1)        # (TB,1) i32

        sel = jnp.zeros((TB, Hp), jnp.float32)

        for l in range(num_layer):
            last_layer = l == num_layer - 1
            if l == 0:
                src = proj0_ref            # bias already folded in outside
                bias = None
            else:
                # Hoisted input projection: one (T*TB,Hp)@(Hp,Hp) matmul.
                proj_ref[...] = jnp.dot(
                    seq_ref[...], wih_refs[l][...],
                    preferred_element_type=jnp.float32).astype(cdt)
                src = proj_ref
                bias = b_refs[l][...]      # (1, Hp) f32, added per step

            h0 = jnp.zeros((TB, Hp), cdt)

            if not last_layer:
                def step(t, h, src=src, whh=whh_refs[l], bias=bias):
                    r0 = pl.multiple_of(t * TB, TB)
                    pre = (src[pl.ds(r0, TB), :].astype(jnp.float32)
                           + jnp.dot(h, whh[...],
                                     preferred_element_type=jnp.float32))
                    if bias is not None:
                        pre = pre + bias
                    h_new = jnp.tanh(pre).astype(cdt)
                    seq_ref[pl.ds(r0, TB), :] = h_new
                    return h_new

                lax.fori_loop(0, T, step, h0, unroll=unroll)
            else:
                # Last layer: no seq store, carry (h, sel) and select in-loop.
                def step(t, carry, src=src, whh=whh_refs[l], bias=bias):
                    h, s = carry
                    r0 = pl.multiple_of(t * TB, TB)
                    pre = (src[pl.ds(r0, TB), :].astype(jnp.float32)
                           + jnp.dot(h, whh[...],
                                     preferred_element_type=jnp.float32))
                    if bias is not None:
                        pre = pre + bias
                    hf = jnp.tanh(pre)                      # f32
                    s = jnp.where(t == last_t, hf, s)       # (TB,1) bcast
                    return hf.astype(cdt), s

                _, sel = lax.fori_loop(0, T, step, (h0, sel), unroll=unroll)

        logits = (jnp.dot(sel.astype(cdt), fcw_ref[...],
                          preferred_element_type=jnp.float32)
                  + fcb_ref[...])
        out_ref[...] = jax.nn.sigmoid(logits)

    return kernel


def sentiment_rnn_forward(x, mask, params, num_layer, compute_dtype=jnp.bfloat16):
    B, T, I = x.shape
    H = params["w_hh"][0].shape[0]
    Hp = _round_up(H, 128)          # lane-dense hidden width
    OUTP = 128                      # lane-dense FC output; real logits = [:, :2]
    cdt = compute_dtype

    # Batch tiling: target 128 rows (keeps the MXU M dimension fed); pad B up
    # to a multiple of the tile.  Small batches use a single sublane-aligned
    # tile.
    TB_TARGET = 128
    B8 = _round_up(B, 8)
    if B8 <= TB_TARGET:
        TB, G = B8, 1
    else:
        TB = TB_TARGET
        G = pl.cdiv(B, TB)
        # TODO(synk): on v7x prefer even G so both TensorCores get a tile.
    B_pad = G * TB

    x_p = jnp.zeros((B_pad, T, I), jnp.float32).at[:B].set(x.astype(jnp.float32))
    lengths = jnp.sum(mask, axis=1).astype(jnp.int32)
    lengths_p = jnp.ones((B_pad,), jnp.int32).at[:B].set(lengths).reshape(B_pad, 1)

    # Layer-0 input projection hoisted out of the kernel (one XLA matmul, f32);
    # result is cast to bf16 and laid out per-tile time-major (t, b_local).
    w_ih0 = params["w_ih"][0].astype(jnp.float32)
    b0 = params["b"][0].astype(jnp.float32)
    proj0 = jnp.einsum("bti,ih->bth", x_p, w_ih0, precision="highest") + b0
    proj0 = _pad_last(proj0, Hp).astype(cdt)                       # (B_pad,T,Hp)
    proj0_tiles = (proj0.reshape(G, TB, T, Hp)
                         .transpose(0, 2, 1, 3)
                         .reshape(G, T * TB, Hp))

    inputs = [proj0_tiles, lengths_p]
    in_specs = [
        pl.BlockSpec((None, T * TB, Hp), lambda g: (g, 0, 0)),
        pl.BlockSpec((TB, 1), lambda g: (g, 0)),
    ]

    w_hh0 = _pad2(params["w_hh"][0].astype(jnp.float32), (Hp, Hp)).astype(cdt)
    inputs.append(w_hh0)
    in_specs.append(pl.BlockSpec((Hp, Hp), lambda g: (0, 0)))
    for l in range(1, num_layer):
        w_ih = _pad2(params["w_ih"][l].astype(jnp.float32), (Hp, Hp)).astype(cdt)
        w_hh = _pad2(params["w_hh"][l].astype(jnp.float32), (Hp, Hp)).astype(cdt)
        bias = _pad2(params["b"][l].astype(jnp.float32), (1, Hp))
        inputs += [w_ih, w_hh, bias]
        in_specs += [
            pl.BlockSpec((Hp, Hp), lambda g: (0, 0)),
            pl.BlockSpec((Hp, Hp), lambda g: (0, 0)),
            pl.BlockSpec((1, Hp), lambda g: (0, 0)),
        ]
    fc_w = _pad2(params["fc_w"].astype(jnp.float32), (Hp, OUTP)).astype(cdt)
    fc_b = _pad2(params["fc_b"].astype(jnp.float32), (1, OUTP))
    inputs += [fc_w, fc_b]
    in_specs += [
        pl.BlockSpec((Hp, OUTP), lambda g: (0, 0)),
        pl.BlockSpec((1, OUTP), lambda g: (0, 0)),
    ]

    scratch_shapes = []
    if num_layer > 1:
        scratch_shapes = [
            pltpu.VMEM((T * TB, Hp), cdt),   # hoisted input projection (l>=1)
            pltpu.VMEM((T * TB, Hp), cdt),   # previous layer output sequence
        ]

    # VMEM budget (lane-padded, bf16-aware), capped below physical capacity.
    bpe = jnp.dtype(cdt).itemsize
    proj0_block = T * TB * Hp * bpe
    len_block = TB * 128 * 4                     # (TB,1) i32, lane-padded
    out_block = TB * OUTP * 4
    weight_bytes = Hp * Hp * bpe                 # w_hh0
    weight_bytes += (num_layer - 1) * (2 * Hp * Hp * bpe + 8 * Hp * 4)
    weight_bytes += Hp * OUTP * bpe + 8 * OUTP * 4
    scratch_bytes = (2 * T * TB * Hp * bpe) if num_layer > 1 else 0
    budget = (2 * (proj0_block + len_block + out_block)
              + 2 * weight_bytes + scratch_bytes)
    try:
        vmem_cap = int(pltpu.get_tpu_info().vmem_capacity_bytes)
    except Exception:
        vmem_cap = 64 * 1024 * 1024              # conservative (v7x per-TC)
    vmem_limit = max(int(budget * 1.25) + (4 << 20), 32 << 20)
    vmem_limit = int(min(vmem_limit, vmem_cap - (8 << 20)))

    kernel = _make_kernel(num_layer, T, TB, Hp, cdt)
    out = pl.pallas_call(
        kernel,
        out_shape=jax.ShapeDtypeStruct((B_pad, OUTP), jnp.float32),
        grid_spec=pltpu.PrefetchScalarGridSpec(
            num_scalar_prefetch=0,
            grid=(G,),
            in_specs=in_specs,
            out_specs=pl.BlockSpec((TB, OUTP), lambda g: (g, 0)),
            scratch_shapes=scratch_shapes,
        ),
        compiler_params=pltpu.CompilerParams(
            dimension_semantics=("parallel",),
            vmem_limit_bytes=vmem_limit,
        ),
    )(*inputs)
    return out[:B, :2]


def reference_forward(x, mask, params, num_layer):
    """Pure-JAX f32 reference matching PyTorch SentimentRNN.forward semantics."""
    B, T, _ = x.shape
    H = params["w_hh"][0].shape[0]
    seq = x
    for l in range(num_layer):
        h = jnp.zeros((B, H), jnp.float32)
        outs = []
        for t in range(T):
            h = jnp.tanh(
                jnp.dot(seq[:, t, :], params["w_ih"][l], precision="highest")
                + jnp.dot(h, params["w_hh"][l], precision="highest")
                + params["b"][l]
            )
            outs.append(h)
        seq = jnp.stack(outs, axis=1)
    lengths = jnp.sum(mask, axis=1).astype(jnp.int32)
    sel = seq[jnp.arange(B), lengths - 1, :]
    return jax.nn.sigmoid(
        jnp.dot(sel, params["fc_w"], precision="highest") + params["fc_b"]
    )


def init_params(key, input_size, hidden_size, num_layer):
    params = {"w_ih": [], "w_hh": [], "b": []}
    for l in range(num_layer):
        in_dim = input_size if l == 0 else hidden_size
        key, k1, k2, k3 = jax.random.split(key, 4)
        params["w_ih"].append(0.1 * jax.random.normal(k1, (in_dim, hidden_size), jnp.float32))
        params["w_hh"].append(0.1 * jax.random.normal(k2, (hidden_size, hidden_size), jnp.float32))
        # b = b_ih + b_hh folded into a single (1, H) bias
        params["b"].append(0.1 * jax.random.normal(k3, (1, hidden_size), jnp.float32))
    key, k4, k5 = jax.random.split(key, 3)
    params["fc_w"] = 0.1 * jax.random.normal(k4, (hidden_size, 2), jnp.float32)
    params["fc_b"] = 0.1 * jax.random.normal(k5, (1, 2), jnp.float32)
    return params


if __name__ == "__main__":
    B, T = 2, 8
    input_size, hidden_size, num_layer = 16, 32, 2

    key = jax.random.PRNGKey(0)
    key, kx = jax.random.split(key)
    x = jax.random.normal(kx, (B, T, input_size), jnp.float32)

    # per-batch valid lengths 5 and 8 -> mask of ones up to the length
    lengths = jnp.array([5, 8], jnp.int32)
    mask = (jnp.arange(T)[None, :] < lengths[:, None]).astype(jnp.float32)

    params = init_params(key, input_size, hidden_size, num_layer)

    out = sentiment_rnn_forward(x, mask, params, num_layer)
    out = jax.block_until_ready(out)

    ref = reference_forward(x, mask, params, num_layer)
    assert out.shape == (B, 2)
    # bf16 MXU operands vs f32 "highest" reference: tolerance loosened accordingly.
    assert jnp.allclose(out, ref, rtol=1e-2, atol=1e-2), (out, ref)

    print("KERNEL_OK")
</pallas_src>

<mosaic_0001>
module attributes {stable_mosaic.version = 11 : i64} {
  func.func @kernel(%arg0: i32, %arg1: memref<1x64x128xbf16, #tpu.memory_space<vmem>>, %arg2: memref<8x1xi32, #tpu.memory_space<vmem>>, %arg3: memref<128x128xbf16, #tpu.memory_space<vmem>>, %arg4: memref<128x128xbf16, #tpu.memory_space<vmem>>, %arg5: memref<128x128xbf16, #tpu.memory_space<vmem>>, %arg6: memref<1x128xf32, #tpu.memory_space<vmem>>, %arg7: memref<128x128xbf16, #tpu.memory_space<vmem>>, %arg8: memref<1x128xf32, #tpu.memory_space<vmem>>, %arg9: memref<8x128xf32, #tpu.memory_space<vmem>>, %arg10: memref<64x128xbf16, #tpu.memory_space<vmem>>, %arg11: memref<64x128xbf16, #tpu.memory_space<vmem>>) attributes {dimension_semantics = [#tpu.dimension_semantics<parallel>], iteration_bounds = array<i64: 1>, scalar_prefetch = 0 : i64, scratch_operands = 2 : i64, tpu.core_type = #tpu.core_type<tc>, window_params = [{transform_indices = @transform_0, window_bounds = array<i64: 1, 64, 128>}, {transform_indices = @transform_1, window_bounds = array<i64: 8, 1>}, {pipeline_mode = #tpu.pipeline_mode<synchronous>, transform_indices = @transform_2, window_bounds = array<i64: 128, 128>}, {pipeline_mode = #tpu.pipeline_mode<synchronous>, transform_indices = @transform_3, window_bounds = array<i64: 128, 128>}, {pipeline_mode = #tpu.pipeline_mode<synchronous>, transform_indices = @transform_4, window_bounds = array<i64: 128, 128>}, {pipeline_mode = #tpu.pipeline_mode<synchronous>, transform_indices = @transform_5, window_bounds = array<i64: 1, 128>}, {pipeline_mode = #tpu.pipeline_mode<synchronous>, transform_indices = @transform_6, window_bounds = array<i64: 128, 128>}, {pipeline_mode = #tpu.pipeline_mode<synchronous>, transform_indices = @transform_7, window_bounds = array<i64: 1, 128>}, {transform_indices = @transform_8, window_bounds = array<i64: 8, 128>}]} {
    %c0 = arith.constant 0 : index
    %c0_0 = arith.constant 0 : index
    %0 = vector.load %arg2[%c0, %c0_0] : memref<8x1xi32, #tpu.memory_space<vmem>>, vector<8x1xi32>
    %c0_i32 = arith.constant 0 : i32
    %1 = vector.broadcast %c0_i32 : i32 to vector<8x1xi32>
    %2 = arith.cmpi sle, %0, %1 : vector<8x1xi32>
    %c1_i32 = arith.constant 1 : i32
    %3 = vector.broadcast %c1_i32 : i32 to vector<8x1xi32>
    %4 = arith.subi %0, %3 : vector<8x1xi32>
    %c7_i32 = arith.constant 7 : i32
    %5 = vector.broadcast %c7_i32 : i32 to vector<8x1xi32>
    %6 = arith.select %2, %5, %4 : vector<8x1xi1>, vector<8x1xi32>
    %cst = arith.constant 0.000000e+00 : f32
    %7 = vector.broadcast %cst : f32 to vector<8x128xf32>
    %cst_1 = arith.constant 0.000000e+00 : bf16
    %8 = vector.broadcast %cst_1 : bf16 to vector<8x128xbf16>
    %c0_i32_2 = arith.constant 0 : i32
    %c8_i32 = arith.constant 8 : i32
    %9 = arith.muli %c0_i32_2, %c8_i32 : i32
    %10 = tpu.assume_multiple %9, 8 : i32
    %c0_3 = arith.constant 0 : index
    %11 = arith.index_cast %10 : i32 to index
    %c0_4 = arith.constant 0 : index
    %12 = vector.load %arg1[%c0_3, %11, %c0_4] : memref<1x64x128xbf16, #tpu.memory_space<vmem>>, vector<1x8x128xbf16>
    %13 = vector.shape_cast %12 : vector<1x8x128xbf16> to vector<8x128xbf16>
    %14 = arith.extf %13 : vector<8x128xbf16> to vector<8x128xf32>
    %c0_5 = arith.constant 0 : index
    %c0_6 = arith.constant 0 : index
    %15 = vector.load %arg3[%c0_5, %c0_6] : memref<128x128xbf16, #tpu.memory_space<vmem>>, vector<128x128xbf16>
    %cst_7 = arith.constant dense<0.000000e+00> : vector<8x128xf32>
    %16 = tpu.matmul %8, %15, %cst_7 {dimension_numbers = #tpu.dot_dimension_numbers<[1], [0], [0], [1], [0, 0, 1, 1], [], []>} : vector<8x128xbf16>, vector<128x128xbf16>, vector<8x128xf32> -> vector<8x128xf32>
    %17 = arith.addf %14, %16 : vector<8x128xf32>
    %18 = math.tanh %17 : vector<8x128xf32>
    %19 = arith.truncf %18 : vector<8x128xf32> to vector<8x128xbf16>
    %20 = arith.index_cast %10 : i32 to index
    %c0_8 = arith.constant 0 : index
    %21 = vector.load %arg11[%20, %c0_8] : memref<64x128xbf16, #tpu.memory_space<vmem>>, vector<8x128xbf16>
    tpu.vector_store %arg11[%20, %c0_8], %19 {strides = array<i32>} : memref<64x128xbf16, #tpu.memory_space<vmem>>, vector<8x128xbf16>,
    %c1_i32_9 = arith.constant 1 : i32
    %c8_i32_10 = arith.constant 8 : i32
    %22 = arith.muli %c1_i32_9, %c8_i32_10 : i32
    %23 = tpu.assume_multiple %22, 8 : i32
    %c0_11 = arith.constant 0 : index
    %24 = arith.index_cast %23 : i32 to index
    %c0_12 = arith.constant 0 : index
    %25 = vector.load %arg1[%c0_11, %24, %c0_12] : memref<1x64x128xbf16, #tpu.memory_space<vmem>>, vector<1x8x128xbf16>
    %26 = vector.shape_cast %25 : vector<1x8x128xbf16> to vector<8x128xbf16>
    %27 = arith.extf %26 : vector<8x128xbf16> to vector<8x128xf32>
    %c0_13 = arith.constant 0 : index
    %c0_14 = arith.constant 0 : index
    %28 = vector.load %arg3[%c0_13, %c0_14] : memref<128x128xbf16, #tpu.memory_space<vmem>>, vector<128x128xbf16>
    %cst_15 = arith.constant dense<0.000000e+00> : vector<8x128xf32>
    %29 = tpu.matmul %19, %28, %cst_15 {dimension_numbers = #tpu.dot_dimension_numbers<[1], [0], [0], [1], [0, 0, 1, 1], [], []>} : vector<8x128xbf16>, vector<128x128xbf16>, vector<8x128xf32> -> vector<8x128xf32>
    %30 = arith.addf %27, %29 : vector<8x128xf32>
    %31 = math.tanh %30 : vector<8x128xf32>
    %32 = arith.truncf %31 : vector<8x128xf32> to vector<8x128xbf16>
    %33 = arith.index_cast %23 : i32 to index
    %c0_16 = arith.constant 0 : index
    %34 = vector.load %arg11[%33, %c0_16] : memref<64x128xbf16, #tpu.memory_space<vmem>>, vector<8x128xbf16>
    tpu.vector_store %arg11[%33, %c0_16], %32 {strides = array<i32>} : memref<64x128xbf16, #tpu.memory_space<vmem>>, vector<8x128xbf16>,
    %c2_i32 = arith.constant 2 : i32
    %c8_i32_17 = arith.constant 8 : i32
    %35 = arith.muli %c2_i32, %c8_i32_17 : i32
    %36 = tpu.assume_multiple %35, 8 : i32
    %c0_18 = arith.constant 0 : index
    %37 = arith.index_cast %36 : i32 to index
    %c0_19 = arith.constant 0 : index
    %38 = vector.load %arg1[%c0_18, %37, %c0_19] : memref<1x64x128xbf16, #tpu.memory_space<vmem>>, vector<1x8x128xbf16>
    %39 = vector.shape_cast %38 : vector<1x8x128xbf16> to vector<8x128xbf16>
    %40 = arith.extf %39 : vector<8x128xbf16> to vector<8x128xf32>
    %c0_20 = arith.constant 0 : index
    %c0_21 = arith.constant 0 : index
    %41 = vector.load %arg3[%c0_20, %c0_21] : memref<128x128xbf16, #tpu.memory_space<vmem>>, vector<128x128xbf16>
    %cst_22 = arith.constant dense<0.000000e+00> : vector<8x128xf32>
    %42 = tpu.matmul %32, %41, %cst_22 {dimension_numbers = #tpu.dot_dimension_numbers<[1], [0], [0], [1], [0, 0, 1, 1], [], []>} : vector<8x128xbf16>, vector<128x128xbf16>, vector<8x128xf32> -> vector<8x128xf32>
    %43 = arith.addf %40, %42 : vector<8x128xf32>
    %44 = math.tanh %43 : vector<8x128xf32>
    %45 = arith.truncf %44 : vector<8x128xf32> to vector<8x128xbf16>
    %46 = arith.index_cast %36 : i32 to index
    %c0_23 = arith.constant 0 : index
    %47 = vector.load %arg11[%46, %c0_23] : memref<64x128xbf16, #tpu.memory_space<vmem>>, vector<8x128xbf16>
    tpu.vector_store %arg11[%46, %c0_23], %45 {strides = array<i32>} : memref<64x128xbf16, #tpu.memory_space<vmem>>, vector<8x128xbf16>,
    %c3_i32 = arith.constant 3 : i32
    %c8_i32_24 = arith.constant 8 : i32
    %48 = arith.muli %c3_i32, %c8_i32_24 : i32
    %49 = tpu.assume_multiple %48, 8 : i32
    %c0_25 = arith.constant 0 : index
    %50 = arith.index_cast %49 : i32 to index
    %c0_26 = arith.constant 0 : index
    %51 = vector.load %arg1[%c0_25, %50, %c0_26] : memref<1x64x128xbf16, #tpu.memory_space<vmem>>, vector<1x8x128xbf16>
    %52 = vector.shape_cast %51 : vector<1x8x128xbf16> to vector<8x128xbf16>
    %53 = arith.extf %52 : vector<8x128xbf16> to vector<8x128xf32>
    %c0_27 = arith.constant 0 : index
    %c0_28 = arith.constant 0 : index
    %54 = vector.load %arg3[%c0_27, %c0_28] : memref<128x128xbf16, #tpu.memory_space<vmem>>, vector<128x128xbf16>
    %cst_29 = arith.constant dense<0.000000e+00> : vector<8x128xf32>
    %55 = tpu.matmul %45, %54, %cst_29 {dimension_numbers = #tpu.dot_dimension_numbers<[1], [0], [0], [1], [0, 0, 1, 1], [], []>} : vector<8x128xbf16>, vector<128x128xbf16>, vector<8x128xf32> -> vector<8x128xf32>
    %56 = arith.addf %53, %55 : vector<8x128xf32>
    %57 = math.tanh %56 : vector<8x128xf32>
    %58 = arith.truncf %57 : vector<8x128xf32> to vector<8x128xbf16>
    %59 = arith.index_cast %49 : i32 to index
    %c0_30 = arith.constant 0 : index
    %60 = vector.load %arg11[%59, %c0_30] : memref<64x128xbf16, #tpu.memory_space<vmem>>, vector<8x128xbf16>
    tpu.vector_store %arg11[%59, %c0_30], %58 {strides = array<i32>} : memref<64x128xbf16, #tpu.memory_space<vmem>>, vector<8x128xbf16>,
    %c4_i32 = arith.constant 4 : i32
    %c8_i32_31 = arith.constant 8 : i32
    %61 = arith.muli %c4_i32, %c8_i32_31 : i32
    %62 = tpu.assume_multiple %61, 8 : i32
    %c0_32 = arith.constant 0 : index
    %63 = arith.index_cast %62 : i32 to index
    %c0_33 = arith.constant 0 : index
    %64 = vector.load %arg1[%c0_32, %63, %c0_33] : memref<1x64x128xbf16, #tpu.memory_space<vmem>>, vector<1x8x128xbf16>
    %65 = vector.shape_cast %64 : vector<1x8x128xbf16> to vector<8x128xbf16>
    %66 = arith.extf %65 : vector<8x128xbf16> to vector<8x128xf32>
    %c0_34 = arith.constant 0 : index
    %c0_35 = arith.constant 0 : index
    %67 = vector.load %arg3[%c0_34, %c0_35] : memref<128x128xbf16, #tpu.memory_space<vmem>>, vector<128x128xbf16>
    %cst_36 = arith.constant dense<0.000000e+00> : vector<8x128xf32>
    %68 = tpu.matmul %58, %67, %cst_36 {dimension_numbers = #tpu.dot_dimension_numbers<[1], [0], [0], [1], [0, 0, 1, 1], [], []>} : vector<8x128xbf16>, vector<128x128xbf16>, vector<8x128xf32> -> vector<8x128xf32>
    %69 = arith.addf %66, %68 : vector<8x128xf32>
    %70 = math.tanh %69 : vector<8x128xf32>
    %71 = arith.truncf %70 : vector<8x128xf32> to vector<8x128xbf16>
    %72 = arith.index_cast %62 : i32 to index
    %c0_37 = arith.constant 0 : index
    %73 = vector.load %arg11[%72, %c0_37] : memref<64x128xbf16, #tpu.memory_space<vmem>>, vector<8x128xbf16>
    tpu.vector_store %arg11[%72, %c0_37], %71 {strides = array<i32>} : memref<64x128xbf16, #tpu.memory_space<vmem>>, vector<8x128xbf16>,
    %c5_i32 = arith.constant 5 : i32
    %c8_i32_38 = arith.constant 8 : i32
    %74 = arith.muli %c5_i32, %c8_i32_38 : i32
    %75 = tpu.assume_multiple %74, 8 : i32
    %c0_39 = arith.constant 0 : index
    %76 = arith.index_cast %75 : i32 to index
    %c0_40 = arith.constant 0 : index
    %77 = vector.load %arg1[%c0_39, %76, %c0_40] : memref<1x64x128xbf16, #tpu.memory_space<vmem>>, vector<1x8x128xbf16>
    %78 = vector.shape_cast %77 : vector<1x8x128xbf16> to vector<8x128xbf16>
    %79 = arith.extf %78 : vector<8x128xbf16> to vector<8x128xf32>
    %c0_41 = arith.constant 0 : index
    %c0_42 = arith.constant 0 : index
    %80 = vector.load %arg3[%c0_41, %c0_42] : memref<128x128xbf16, #tpu.memory_space<vmem>>, vector<128x128xbf16>
    %cst_43 = arith.constant dense<0.000000e+00> : vector<8x128xf32>
    %81 = tpu.matmul %71, %80, %cst_43 {dimension_numbers = #tpu.dot_dimension_numbers<[1], [0], [0], [1], [0, 0, 1, 1], [], []>} : vector<8x128xbf16>, vector<128x128xbf16>, vector<8x128xf32> -> vector<8x128xf32>
    %82 = arith.addf %79, %81 : vector<8x128xf32>
    %83 = math.tanh %82 : vector<8x128xf32>
    %84 = arith.truncf %83 : vector<8x128xf32> to vector<8x128xbf16>
    %85 = arith.index_cast %75 : i32 to index
    %c0_44 = arith.constant 0 : index
    %86 = vector.load %arg11[%85, %c0_44] : memref<64x128xbf16, #tpu.memory_space<vmem>>, vector<8x128xbf16>
    tpu.vector_store %arg11[%85, %c0_44], %84 {strides = array<i32>} : memref<64x128xbf16, #tpu.memory_space<vmem>>, vector<8x128xbf16>,
    %c6_i32 = arith.constant 6 : i32
    %c8_i32_45 = arith.constant 8 : i32
    %87 = arith.muli %c6_i32, %c8_i32_45 : i32
    %88 = tpu.assume_multiple %87, 8 : i32
    %c0_46 = arith.constant 0 : index
    %89 = arith.index_cast %88 : i32 to index
    %c0_47 = arith.constant 0 : index
    %90 = vector.load %arg1[%c0_46, %89, %c0_47] : memref<1x64x128xbf16, #tpu.memory_space<vmem>>, vector<1x8x128xbf16>
    %91 = vector.shape_cast %90 : vector<1x8x128xbf16> to vector<8x128xbf16>
    %92 = arith.extf %91 : vector<8x128xbf16> to vector<8x128xf32>
    %c0_48 = arith.constant 0 : index
    %c0_49 = arith.constant 0 : index
    %93 = vector.load %arg3[%c0_48, %c0_49] : memref<128x128xbf16, #tpu.memory_space<vmem>>, vector<128x128xbf16>
    %cst_50 = arith.constant dense<0.000000e+00> : vector<8x128xf32>
    %94 = tpu.matmul %84, %93, %cst_50 {dimension_numbers = #tpu.dot_dimension_numbers<[1], [0], [0], [1], [0, 0, 1, 1], [], []>} : vector<8x128xbf16>, vector<128x128xbf16>, vector<8x128xf32> -> vector<8x128xf32>
    %95 = arith.addf %92, %94 : vector<8x128xf32>
    %96 = math.tanh %95 : vector<8x128xf32>
    %97 = arith.truncf %96 : vector<8x128xf32> to vector<8x128xbf16>
    %98 = arith.index_cast %88 : i32 to index
    %c0_51 = arith.constant 0 : index
    %99 = vector.load %arg11[%98, %c0_51] : memref<64x128xbf16, #tpu.memory_space<vmem>>, vector<8x128xbf16>
    tpu.vector_store %arg11[%98, %c0_51], %97 {strides = array<i32>} : memref<64x128xbf16, #tpu.memory_space<vmem>>, vector<8x128xbf16>,
    %c7_i32_52 = arith.constant 7 : i32
    %c8_i32_53 = arith.constant 8 : i32
    %100 = arith.muli %c7_i32_52, %c8_i32_53 : i32
    %101 = tpu.assume_multiple %100, 8 : i32
    %c0_54 = arith.constant 0 : index
    %102 = arith.index_cast %101 : i32 to index
    %c0_55 = arith.constant 0 : index
    %103 = vector.load %arg1[%c0_54, %102, %c0_55] : memref<1x64x128xbf16, #tpu.memory_space<vmem>>, vector<1x8x128xbf16>
    %104 = vector.shape_cast %103 : vector<1x8x128xbf16> to vector<8x128xbf16>
    %105 = arith.extf %104 : vector<8x128xbf16> to vector<8x128xf32>
    %c0_56 = arith.constant 0 : index
    %c0_57 = arith.constant 0 : index
    %106 = vector.load %arg3[%c0_56, %c0_57] : memref<128x128xbf16, #tpu.memory_space<vmem>>, vector<128x128xbf16>
    %cst_58 = arith.constant dense<0.000000e+00> : vector<8x128xf32>
    %107 = tpu.matmul %97, %106, %cst_58 {dimension_numbers = #tpu.dot_dimension_numbers<[1], [0], [0], [1], [0, 0, 1, 1], [], []>} : vector<8x128xbf16>, vector<128x128xbf16>, vector<8x128xf32> -> vector<8x128xf32>
    %108 = arith.addf %105, %107 : vector<8x128xf32>
    %109 = math.tanh %108 : vector<8x128xf32>
    %110 = arith.truncf %109 : vector<8x128xf32> to vector<8x128xbf16>
    %111 = arith.index_cast %101 : i32 to index
    %c0_59 = arith.constant 0 : index
    %112 = vector.load %arg11[%111, %c0_59] : memref<64x128xbf16, #tpu.memory_space<vmem>>, vector<8x128xbf16>
    tpu.vector_store %arg11[%111, %c0_59], %110 {strides = array<i32>} : memref<64x128xbf16, #tpu.memory_space<vmem>>, vector<8x128xbf16>,
    %c8_i32_60 = arith.constant 8 : i32
    %c0_61 = arith.constant 0 : index
    %c0_62 = arith.constant 0 : index
    %113 = vector.load %arg11[%c0_61, %c0_62] : memref<64x128xbf16, #tpu.memory_space<vmem>>, vector<64x128xbf16>
    %c0_63 = arith.constant 0 : index
    %c0_64 = arith.constant 0 : index
    %114 = vector.load %arg4[%c0_63, %c0_64] : memref<128x128xbf16, #tpu.memory_space<vmem>>, vector<128x128xbf16>
    %cst_65 = arith.constant dense<0.000000e+00> : vector<64x128xf32>
    %115 = tpu.matmul %113, %114, %cst_65 {dimension_numbers = #tpu.dot_dimension_numbers<[1], [0], [0], [1], [0, 0, 1, 1], [], []>} : vector<64x128xbf16>, vector<128x128xbf16>, vector<64x128xf32> -> vector<64x128xf32>
    %116 = arith.truncf %115 : vector<64x128xf32> to vector<64x128xbf16>
    %c0_66 = arith.constant 0 : index
    %c0_67 = arith.constant 0 : index
    %117 = vector.load %arg10[%c0_66, %c0_67] : memref<64x128xbf16, #tpu.memory_space<vmem>>, vector<64x128xbf16>
    tpu.vector_store %arg10[%c0_66, %c0_67], %116 {strides = array<i32>} : memref<64x128xbf16, #tpu.memory_space<vmem>>, vector<64x128xbf16>,
    %c0_68 = arith.constant 0 : index
    %c0_69 = arith.constant 0 : index
    %118 = vector.load %arg6[%c0_68, %c0_69] : memref<1x128xf32, #tpu.memory_space<vmem>>, vector<1x128xf32>
    %cst_70 = arith.constant 0.000000e+00 : bf16
    %119 = vector.broadcast %cst_70 : bf16 to vector<8x128xbf16>
    %c0_i32_71 = arith.constant 0 : i32
    %c8_i32_72 = arith.constant 8 : i32
    %120 = arith.muli %c0_i32_71, %c8_i32_72 : i32
    %121 = tpu.assume_multiple %120, 8 : i32
    %122 = arith.index_cast %121 : i32 to index
    %c0_73 = arith.constant 0 : index
    %123 = vector.load %arg10[%122, %c0_73] : memref<64x128xbf16, #tpu.memory_space<vmem>>, vector<8x128xbf16>
    %124 = arith.extf %123 : vector<8x128xbf16> to vector<8x128xf32>
    %c0_74 = arith.constant 0 : index
    %c0_75 = arith.constant 0 : index
    %125 = vector.load %arg5[%c0_74, %c0_75] : memref<128x128xbf16, #tpu.memory_space<vmem>>, vector<128x128xbf16>
    %cst_76 = arith.constant dense<0.000000e+00> : vector<8x128xf32>
    %126 = tpu.matmul %119, %125, %cst_76 {dimension_numbers = #tpu.dot_dimension_numbers<[1], [0], [0], [1], [0, 0, 1, 1], [], []>} : vector<8x128xbf16>, vector<128x128xbf16>, vector<8x128xf32> -> vector<8x128xf32>
    %127 = arith.addf %124, %126 : vector<8x128xf32>
    %128 = vector.broadcast %118 : vector<1x128xf32> to vector<8x128xf32>
    %129 = arith.addf %127, %128 : vector<8x128xf32>
    %130 = math.tanh %129 : vector<8x128xf32>
    %131 = vector.broadcast %c0_i32_71 : i32 to vector<8x1xi32>
    %132 = arith.cmpi eq, %131, %6 : vector<8x1xi32>
    %133 = vector.shape_cast %132 : vector<8x1xi1> to vector<8x1xi1>
    %134 = vector.broadcast %133 : vector<8x1xi1> to vector<8x128xi1>
    %135 = arith.select %134, %130, %7 : vector<8x128xi1>, vector<8x128xf32>
    %136 = arith.truncf %130 : vector<8x128xf32> to vector<8x128xbf16>
    %c1_i32_77 = arith.constant 1 : i32
    %c8_i32_78 = arith.constant 8 : i32
    %137 = arith.muli %c1_i32_77, %c8_i32_78 : i32
    %138 = tpu.assume_multiple %137, 8 : i32
    %139 = arith.index_cast %138 : i32 to index
    %c0_79 = arith.constant 0 : index
    %140 = vector.load %arg10[%139, %c0_79] : memref<64x128xbf16, #tpu.memory_space<vmem>>, vector<8x128xbf16>
    %141 = arith.extf %140 : vector<8x128xbf16> to vector<8x128xf32>
    %c0_80 = arith.constant 0 : index
    %c0_81 = arith.constant 0 : index
    %142 = vector.load %arg5[%c0_80, %c0_81] : memref<128x128xbf16, #tpu.memory_space<vmem>>, vector<128x128xbf16>
    %cst_82 = arith.constant dense<0.000000e+00> : vector<8x128xf32>
    %143 = tpu.matmul %136, %142, %cst_82 {dimension_numbers = #tpu.dot_dimension_numbers<[1], [0], [0], [1], [0, 0, 1, 1], [], []>} : vector<8x128xbf16>, vector<128x128xbf16>, vector<8x128xf32> -> vector<8x128xf32>
    %144 = arith.addf %141, %143 : vector<8x128xf32>
    %145 = vector.broadcast %118 : vector<1x128xf32> to vector<8x128xf32>
    %146 = arith.addf %144, %145 : vector<8x128xf32>
    %147 = math.tanh %146 : vector<8x128xf32>
    %148 = vector.broadcast %c1_i32_77 : i32 to vector<8x1xi32>
    %149 = arith.cmpi eq, %148, %6 : vector<8x1xi32>
    %150 = vector.shape_cast %149 : vector<8x1xi1> to vector<8x1xi1>
    %151 = vector.broadcast %150 : vector<8x1xi1> to vector<8x128xi1>
    %152 = arith.select %151, %147, %135 : vector<8x128xi1>, vector<8x128xf32>
    %153 = arith.truncf %147 : vector<8x128xf32> to vector<8x128xbf16>
    %c2_i32_83 = arith.constant 2 : i32
    %c8_i32_84 = arith.constant 8 : i32
    %154 = arith.muli %c2_i32_83, %c8_i32_84 : i32
    %155 = tpu.assume_multiple %154, 8 : i32
    %156 = arith.index_cast %155 : i32 to index
    %c0_85 = arith.constant 0 : index
    %157 = vector.load %arg10[%156, %c0_85] : memref<64x128xbf16, #tpu.memory_space<vmem>>, vector<8x128xbf16>
    %158 = arith.extf %157 : vector<8x128xbf16> to vector<8x128xf32>
    %c0_86 = arith.constant 0 : index
    %c0_87 = arith.constant 0 : index
    %159 = vector.load %arg5[%c0_86, %c0_87] : memref<128x128xbf16, #tpu.memory_space<vmem>>, vector<128x128xbf16>
    %cst_88 = arith.constant dense<0.000000e+00> : vector<8x128xf32>
    %160 = tpu.matmul %153, %159, %cst_88 {dimension_numbers = #tpu.dot_dimension_numbers<[1], [0], [0], [1], [0, 0, 1, 1], [], []>} : vector<8x128xbf16>, vector<128x128xbf16>, vector<8x128xf32> -> vector<8x128xf32>
    %161 = arith.addf %158, %160 : vector<8x128xf32>
    %162 = vector.broadcast %118 : vector<1x128xf32> to vector<8x128xf32>
    %163 = arith.addf %161, %162 : vector<8x128xf32>
    %164 = math.tanh %163 : vector<8x128xf32>
    %165 = vector.broadcast %c2_i32_83 : i32 to vector<8x1xi32>
    %166 = arith.cmpi eq, %165, %6 : vector<8x1xi32>
    %167 = vector.shape_cast %166 : vector<8x1xi1> to vector<8x1xi1>
    %168 = vector.broadcast %167 : vector<8x1xi1> to vector<8x128xi1>
    %169 = arith.select %168, %164, %152 : vector<8x128xi1>, vector<8x128xf32>
    %170 = arith.truncf %164 : vector<8x128xf32> to vector<8x128xbf16>
    %c3_i32_89 = arith.constant 3 : i32
    %c8_i32_90 = arith.constant 8 : i32
    %171 = arith.muli %c3_i32_89, %c8_i32_90 : i32
    %172 = tpu.assume_multiple %171, 8 : i32
    %173 = arith.index_cast %172 : i32 to index
    %c0_91 = arith.constant 0 : index
    %174 = vector.load %arg10[%173, %c0_91] : memref<64x128xbf16, #tpu.memory_space<vmem>>, vector<8x128xbf16>
    %175 = arith.extf %174 : vector<8x128xbf16> to vector<8x128xf32>
    %c0_92 = arith.constant 0 : index
    %c0_93 = arith.constant 0 : index
    %176 = vector.load %arg5[%c0_92, %c0_93] : memref<128x128xbf16, #tpu.memory_space<vmem>>, vector<128x128xbf16>
    %cst_94 = arith.constant dense<0.000000e+00> : vector<8x128xf32>
    %177 = tpu.matmul %170, %176, %cst_94 {dimension_numbers = #tpu.dot_dimension_numbers<[1], [0], [0], [1], [0, 0, 1, 1], [], []>} : vector<8x128xbf16>, vector<128x128xbf16>, vector<8x128xf32> -> vector<8x128xf32>
    %178 = arith.addf %175, %177 : vector<8x128xf32>
    %179 = vector.broadcast %118 : vector<1x128xf32> to vector<8x128xf32>
    %180 = arith.addf %178, %179 : vector<8x128xf32>
    %181 = math.tanh %180 : vector<8x128xf32>
    %182 = vector.broadcast %c3_i32_89 : i32 to vector<8x1xi32>
    %183 = arith.cmpi eq, %182, %6 : vector<8x1xi32>
    %184 = vector.shape_cast %183 : vector<8x1xi1> to vector<8x1xi1>
    %185 = vector.broadcast %184 : vector<8x1xi1> to vector<8x128xi1>
    %186 = arith.select %185, %181, %169 : vector<8x128xi1>, vector<8x128xf32>
    %187 = arith.truncf %181 : vector<8x128xf32> to vector<8x128xbf16>
    %c4_i32_95 = arith.constant 4 : i32
    %c8_i32_96 = arith.constant 8 : i32
    %188 = arith.muli %c4_i32_95, %c8_i32_96 : i32
    %189 = tpu.assume_multiple %188, 8 : i32
    %190 = arith.index_cast %189 : i32 to index
    %c0_97 = arith.constant 0 : index
    %191 = vector.load %arg10[%190, %c0_97] : memref<64x128xbf16, #tpu.memory_space<vmem>>, vector<8x128xbf16>
    %192 = arith.extf %191 : vector<8x128xbf16> to vector<8x128xf32>
    %c0_98 = arith.constant 0 : index
    %c0_99 = arith.constant 0 : index
    %193 = vector.load %arg5[%c0_98, %c0_99] : memref<128x128xbf16, #tpu.memory_space<vmem>>, vector<128x128xbf16>
    %cst_100 = arith.constant dense<0.000000e+00> : vector<8x128xf32>
    %194 = tpu.matmul %187, %193, %cst_100 {dimension_numbers = #tpu.dot_dimension_numbers<[1], [0], [0], [1], [0, 0, 1, 1], [], []>} : vector<8x128xbf16>, vector<128x128xbf16>, vector<8x128xf32> -> vector<8x128xf32>
    %195 = arith.addf %192, %194 : vector<8x128xf32>
    %196 = vector.broadcast %118 : vector<1x128xf32> to vector<8x128xf32>
    %197 = arith.addf %195, %196 : vector<8x128xf32>
    %198 = math.tanh %197 : vector<8x128xf32>
    %199 = vector.broadcast %c4_i32_95 : i32 to vector<8x1xi32>
    %200 = arith.cmpi eq, %199, %6 : vector<8x1xi32>
    %201 = vector.shape_cast %200 : vector<8x1xi1> to vector<8x1xi1>
    %202 = vector.broadcast %201 : vector<8x1xi1> to vector<8x128xi1>
    %203 = arith.select %202, %198, %186 : vector<8x128xi1>, vector<8x128xf32>
    %204 = arith.truncf %198 : vector<8x128xf32> to vector<8x128xbf16>
    %c5_i32_101 = arith.constant 5 : i32
    %c8_i32_102 = arith.constant 8 : i32
    %205 = arith.muli %c5_i32_101, %c8_i32_102 : i32
    %206 = tpu.assume_multiple %205, 8 : i32
    %207 = arith.index_cast %206 : i32 to index
    %c0_103 = arith.constant 0 : index
    %208 = vector.load %arg10[%207, %c0_103] : memref<64x128xbf16, #tpu.memory_space<vmem>>, vector<8x128xbf16>
    %209 = arith.extf %208 : vector<8x128xbf16> to vector<8x128xf32>
    %c0_104 = arith.constant 0 : index
    %c0_105 = arith.constant 0 : index
    %210 = vector.load %arg5[%c0_104, %c0_105] : memref<128x128xbf16, #tpu.memory_space<vmem>>, vector<128x128xbf16>
    %cst_106 = arith.constant dense<0.000000e+00> : vector<8x128xf32>
    %211 = tpu.matmul %204, %210, %cst_106 {dimension_numbers = #tpu.dot_dimension_numbers<[1], [0], [0], [1], [0, 0, 1, 1], [], []>} : vector<8x128xbf16>, vector<128x128xbf16>, vector<8x128xf32> -> vector<8x128xf32>
    %212 = arith.addf %209, %211 : vector<8x128xf32>
    %213 = vector.broadcast %118 : vector<1x128xf32> to vector<8x128xf32>
    %214 = arith.addf %212, %213 : vector<8x128xf32>
    %215 = math.tanh %214 : vector<8x128xf32>
    %216 = vector.broadcast %c5_i32_101 : i32 to vector<8x1xi32>
    %217 = arith.cmpi eq, %216, %6 : vector<8x1xi32>
    %218 = vector.shape_cast %217 : vector<8x1xi1> to vector<8x1xi1>
    %219 = vector.broadcast %218 : vector<8x1xi1> to vector<8x128xi1>
    %220 = arith.select %219, %215, %203 : vector<8x128xi1>, vector<8x128xf32>
    %221 = arith.truncf %215 : vector<8x128xf32> to vector<8x128xbf16>
    %c6_i32_107 = arith.constant 6 : i32
    %c8_i32_108 = arith.constant 8 : i32
    %222 = arith.muli %c6_i32_107, %c8_i32_108 : i32
    %223 = tpu.assume_multiple %222, 8 : i32
    %224 = arith.index_cast %223 : i32 to index
    %c0_109 = arith.constant 0 : index
    %225 = vector.load %arg10[%224, %c0_109] : memref<64x128xbf16, #tpu.memory_space<vmem>>, vector<8x128xbf16>
    %226 = arith.extf %225 : vector<8x128xbf16> to vector<8x128xf32>
    %c0_110 = arith.constant 0 : index
    %c0_111 = arith.constant 0 : index
    %227 = vector.load %arg5[%c0_110, %c0_111] : memref<128x128xbf16, #tpu.memory_space<vmem>>, vector<128x128xbf16>
    %cst_112 = arith.constant dense<0.000000e+00> : vector<8x128xf32>
    %228 = tpu.matmul %221, %227, %cst_112 {dimension_numbers = #tpu.dot_dimension_numbers<[1], [0], [0], [1], [0, 0, 1, 1], [], []>} : vector<8x128xbf16>, vector<128x128xbf16>, vector<8x128xf32> -> vector<8x128xf32>
    %229 = arith.addf %226, %228 : vector<8x128xf32>
    %230 = vector.broadcast %118 : vector<1x128xf32> to vector<8x128xf32>
    %231 = arith.addf %229, %230 : vector<8x128xf32>
    %232 = math.tanh %231 : vector<8x128xf32>
    %233 = vector.broadcast %c6_i32_107 : i32 to vector<8x1xi32>
    %234 = arith.cmpi eq, %233, %6 : vector<8x1xi32>
    %235 = vector.shape_cast %234 : vector<8x1xi1> to vector<8x1xi1>
    %236 = vector.broadcast %235 : vector<8x1xi1> to vector<8x128xi1>
    %237 = arith.select %236, %232, %220 : vector<8x128xi1>, vector<8x128xf32>
    %238 = arith.truncf %232 : vector<8x128xf32> to vector<8x128xbf16>
    %c7_i32_113 = arith.constant 7 : i32
    %c8_i32_114 = arith.constant 8 : i32
    %239 = arith.muli %c7_i32_113, %c8_i32_114 : i32
    %240 = tpu.assume_multiple %239, 8 : i32
    %241 = arith.index_cast %240 : i32 to index
    %c0_115 = arith.constant 0 : index
    %242 = vector.load %arg10[%241, %c0_115] : memref<64x128xbf16, #tpu.memory_space<vmem>>, vector<8x128xbf16>
    %243 = arith.extf %242 : vector<8x128xbf16> to vector<8x128xf32>
    %c0_116 = arith.constant 0 : index
    %c0_117 = arith.constant 0 : index
    %244 = vector.load %arg5[%c0_116, %c0_117] : memref<128x128xbf16, #tpu.memory_space<vmem>>, vector<128x128xbf16>
    %cst_118 = arith.constant dense<0.000000e+00> : vector<8x128xf32>
    %245 = tpu.matmul %238, %244, %cst_118 {dimension_numbers = #tpu.dot_dimension_numbers<[1], [0], [0], [1], [0, 0, 1, 1], [], []>} : vector<8x128xbf16>, vector<128x128xbf16>, vector<8x128xf32> -> vector<8x128xf32>
    %246 = arith.addf %243, %245 : vector<8x128xf32>
    %247 = vector.broadcast %118 : vector<1x128xf32> to vector<8x128xf32>
    %248 = arith.addf %246, %247 : vector<8x128xf32>
    %249 = math.tanh %248 : vector<8x128xf32>
    %250 = vector.broadcast %c7_i32_113 : i32 to vector<8x1xi32>
    %251 = arith.cmpi eq, %250, %6 : vector<8x1xi32>
    %252 = vector.shape_cast %251 : vector<8x1xi1> to vector<8x1xi1>
    %253 = vector.broadcast %252 : vector<8x1xi1> to vector<8x128xi1>
    %254 = arith.select %253, %249, %237 : vector<8x128xi1>, vector<8x128xf32>
    %255 = arith.truncf %249 : vector<8x128xf32> to vector<8x128xbf16>
    %c8_i32_119 = arith.constant 8 : i32
    %256 = arith.truncf %254 : vector<8x128xf32> to vector<8x128xbf16>
    %c0_120 = arith.constant 0 : index
    %c0_121 = arith.constant 0 : index
    %257 = vector.load %arg7[%c0_120, %c0_121] : memref<128x128xbf16, #tpu.memory_space<vmem>>, vector<128x128xbf16>
    %cst_122 = arith.constant dense<0.000000e+00> : vector<8x128xf32>
    %258 = tpu.matmul %256, %257, %cst_122 {dimension_numbers = #tpu.dot_dimension_numbers<[1], [0], [0], [1], [0, 0, 1, 1], [], []>} : vector<8x128xbf16>, vector<128x128xbf16>, vector<8x128xf32> -> vector<8x128xf32>
    %c0_123 = arith.constant 0 : index
    %c0_124 = arith.constant 0 : index
    %259 = vector.load %arg8[%c0_123, %c0_124] : memref<1x128xf32, #tpu.memory_space<vmem>>, vector<1x128xf32>
    %260 = vector.broadcast %259 : vector<1x128xf32> to vector<8x128xf32>
    %261 = arith.addf %258, %260 : vector<8x128xf32>
    %262 = arith.negf %261 : vector<8x128xf32>
    %263 = math.exp %262 : vector<8x128xf32>
    %cst_125 = arith.constant 1.000000e+00 : f32
    %264 = vector.broadcast %cst_125 : f32 to vector<8x128xf32>
    %265 = arith.addf %264, %263 : vector<8x128xf32>
    %266 = arith.divf %264, %265 : vector<8x128xf32>
    %c0_126 = arith.constant 0 : index
    %c0_127 = arith.constant 0 : index
    %267 = vector.load %arg9[%c0_126, %c0_127] : memref<8x128xf32, #tpu.memory_space<vmem>>, vector<8x128xf32>
    tpu.vector_store %arg9[%c0_126, %c0_127], %266 {strides = array<i32>} : memref<8x128xf32, #tpu.memory_space<vmem>>, vector<8x128xf32>,
    return
  }
  func.func @transform_0(%arg0: i32) -> (i32, i32, i32) {
    %c0_i32 = arith.constant 0 : i32
    %c0_i32_0 = arith.constant 0 : i32
    %c0_i32_1 = arith.constant 0 : i32
    return %arg0, %c0_i32, %c0_i32_0 : i32, i32, i32
  }
  func.func @transform_1(%arg0: i32) -> (i32, i32) {
    %c0_i32 = arith.constant 0 : i32
    %c0_i32_0 = arith.constant 0 : i32
    return %arg0, %c0_i32 : i32, i32
  }
  func.func @transform_2(%arg0: i32) -> (i32, i32) {
    %c0_i32 = arith.constant 0 : i32
    %c0_i32_0 = arith.constant 0 : i32
    %c0_i32_1 = arith.constant 0 : i32
    return %c0_i32, %c0_i32_0 : i32, i32
  }
  func.func @transform_3(%arg0: i32) -> (i32, i32) {
    %c0_i32 = arith.constant 0 : i32
    %c0_i32_0 = arith.constant 0 : i32
    %c0_i32_1 = arith.constant 0 : i32
    return %c0_i32, %c0_i32_0 : i32, i32
  }
  func.func @transform_4(%arg0: i32) -> (i32, i32) {
    %c0_i32 = arith.constant 0 : i32
    %c0_i32_0 = arith.constant 0 : i32
    %c0_i32_1 = arith.constant 0 : i32
    return %c0_i32, %c0_i32_0 : i32, i32
  }
  func.func @transform_5(%arg0: i32) -> (i32, i32) {
    %c0_i32 = arith.constant 0 : i32
    %c0_i32_0 = arith.constant 0 : i32
    %c0_i32_1 = arith.constant 0 : i32
    return %c0_i32, %c0_i32_0 : i32, i32
  }
  func.func @transform_6(%arg0: i32) -> (i32, i32) {
    %c0_i32 = arith.constant 0 : i32
    %c0_i32_0 = arith.constant 0 : i32
    %c0_i32_1 = arith.constant 0 : i32
    return %c0_i32, %c0_i32_0 : i32, i32
  }
  func.func @transform_7(%arg0: i32) -> (i32, i32) {
    %c0_i32 = arith.constant 0 : i32
    %c0_i32_0 = arith.constant 0 : i32
    %c0_i32_1 = arith.constant 0 : i32
    return %c0_i32, %c0_i32_0 : i32, i32
  }
  func.func @transform_8(%arg0: i32) -> (i32, i32) {
    %c0_i32 = arith.constant 0 : i32
    %c0_i32_0 = arith.constant 0 : i32
    return %arg0, %c0_i32 : i32, i32
  }
}

</mosaic_0001>

<bundles_post_ra>
// kernel: tpu_custom_call.1
= control target key start
LH: loop header
LB: loop body
LE: loop exit
PB: predicated region body
PF: predicated region fallthrough
CT: control target
= control target key end

     0   :  { %13 = vsyncpa [#allocation5], 0  ;;  %s2220_s0 = inlined_call_operand.hbm [shape: bf16[1,64,128], index: 0, kind: input, shape index: {}]   ;;  %s2221_s1 = inlined_call_operand.vmem [shape: s32[8,1], index: 1, kind: input, shape index: {}]   ;;  %s2222_s2 = inlined_call_operand.hbm [shape: bf16[128,128], index: 2, kind: input, shape index: {}]   ;;  %s2223_s3 = inlined_call_operand.hbm [shape: bf16[128,128], index: 3, kind: input, shape index: {}]   ;;  %s2224_s4 = inlined_call_operand.hbm [shape: bf16[128,128], index: 4, kind: input, shape index: {}]   ;;  %s2225_s5 = inlined_call_operand.vmem [shape: f32[1,128], index: 5, kind: input, shape index: {}]   ;;  %s2226_s6 = inlined_call_operand.hbm [shape: bf16[128,128], index: 6, kind: input, shape index: {}]   ;;  %s2227_s7 = inlined_call_operand.vmem [shape: f32[1,128], index: 7, kind: input, shape index: {}]   ;;  %s2228_s8 = inlined_call_operand.hbm [shape: f32[8,128], index: 8, kind: output, shape index: {}]  }
   0x1   :  { %14 = vsyncpa [#allocation8], 0 }
   0x2   :  { %15 = vsyncpa [#allocation11], 0 }
   0x3   :  { %16 = vsyncpa [#allocation6], 0  ;;  %s36_s29 = sshll.u32 %s2222_s2, 4  ;;  %s2022_s30 = smov [#allocation7]   ;;  %s37_s29 = int_to_ptr.hbm [resolvable:$true] %s36_s29 }
   0x4   :  { %s38_s9 = sshll.u32 %s2022_s30, 4  ;;  %s62_s12 = sshll.u32 %s2224_s4, 4  ;;  %s39_s9 = int_to_ptr.vmem [resolvable:$true] %s38_s9  ;;  %s63_s12 = int_to_ptr.hbm [resolvable:$true] %s62_s12 }
   0x5   :  { %s2023_s13 = smov 64   ;;  %s2024_s14 = smov 4  }
   0x6   :  { %44 = dma.hbm_to_vmem [thread:$0]  %s37_s29, 1024, %s39_s9, [#allocation8], %s2023_s13, %s2023_s13, %s2024_s14  }
   0x7   :  { %s2025_s15 = smov [#allocation10]   ;;  %s21_s19 = sshll.u32 %s2220_s0, 4  ;;  %s22_s19 = int_to_ptr.hbm [resolvable:$true] %s21_s19 }
   0x8   :  { %s64_s16 = sshll.u32 %s2025_s15, 4  ;;  %s49_s21 = sshll.u32 %s2223_s3, 4  ;;  %s65_s16 = int_to_ptr.vmem [resolvable:$true] %s64_s16  ;;  %s50_s21 = int_to_ptr.hbm [resolvable:$true] %s49_s21 }
   0x9   :  { %70 = dma.hbm_to_vmem [thread:$0]  %s63_s12, 1024, %s65_s16, [#allocation11], %s2023_s13, %s2023_s13, %s2024_s14  }
   0xa   :  { %s2026_s22 = smov [#allocation4]   ;;  %s2027_s4 = smov [#allocation9]  }
   0xb   :  { %s23_s23 = sshll.u32 %s2026_s22, 4  ;;  %s51_s24 = sshll.u32 %s2027_s4, 4  ;;  %s24_s23 = int_to_ptr.vmem [resolvable:$true] %s23_s23  ;;  %s52_s24 = int_to_ptr.vmem [resolvable:$true] %s51_s24 }
   0xc   :  { %29 = dma.hbm_to_vmem [thread:$0]  %s22_s19, 512, %s24_s23, [#allocation5], %s2023_s13, %s2023_s13, %s2024_s14  }
   0xd   :  { %s77_s27 = sshll.u32 %s2226_s6, 4  ;;  %s2028_s0 = smov [#allocation12]   ;;  %s78_s27 = int_to_ptr.hbm [resolvable:$true] %s77_s27 }
   0xe   :  { %57 = dma.hbm_to_vmem [thread:$0]  %s50_s21, 1024, %s52_s24, [#allocation8], %s2023_s13, %s2023_s13, %s2024_s14  }
   0xf   :  { %s79_s28 = sshll.u32 %s2028_s0, 4  ;;  %s80_s28 = int_to_ptr.vmem [resolvable:$true] %s79_s28 }
  0x10   :  { %85 = dma.hbm_to_vmem [thread:$0]  %s78_s27, 1024, %s80_s28, [#allocation11], %s2023_s13, %s2023_s13, %s2024_s14  }
  0x11   :  { %2014 = dma.done.wait [#allocation5], 512  }
  0x12   :  { %2015 = vsyncadd [#allocation5], 4294966784 }
  0x13   :  { %2016 = dma.done.wait [#allocation8], 2048  }
  0x14   :  { %2017 = vsyncadd [#allocation8], 4294965248 }
  0x15   :  { %2018 = dma.done.wait [#allocation11], 2048  }
  0x16   :  { %2019 = vsyncadd [#allocation11], 4294965248  ;;  %v2029_v0 = vmov 0   ;;  %v1712_v1 = vld [vmem:[#allocation7 + $0x38] sm:$0xff]  ;;  %v1711_v2 = vld [vmem:[#allocation7 + $0x30] sm:$0xff]  ;;  %s2030_s9 = smov [#allocation13]  }
  0x17   :  { %1829 = vset.pattern.permute.xlu0 %v2029_v0  ;;  %1830 = vset.pattern.permute.xlu1 %v2029_v0  ;;  %v1720_v3 = vld [vmem:[#allocation7 + $0x38] sm:$0xff]  ;;  %v1719_v4 = vld [vmem:[#allocation7 + $0x30] sm:$0xff]  ;;  %v1710_v5 = vld [vmem:[#allocation7 + $0x28] sm:$0xff]  ;;  %s1321_s10 = sshll.u32 %s2030_s9, 4  ;;  %s1322_s10 = int_to_ptr.vmem [resolvable:$true] %s1321_s10 }
  0x18   :  { %1831 = vset.pattern.permute.xlu2 %v2029_v0  ;;  %179 = vmatpush.bf16.msra.mxu0 %v1712_v1  ;;  %v1718_v6 = vld [vmem:[#allocation7 + $0x28] sm:$0xff]  ;;  %v1709_v7 = vld [vmem:[#allocation7 + $0x20] sm:$0xff]  ;;  %v1708_v9 = vld [vmem:[#allocation7 + $0x18] sm:$0xff] }
  0x19   :  { %263 = vmatpush.bf16.msra.mxu1 %v1720_v3  ;;  %v1717_v8 = vld [vmem:[#allocation7 + $0x20] sm:$0xff]  ;;  %v1716_v10 = vld [vmem:[#allocation7 + $0x18] sm:$0xff]  ;;  %v1707_v11 = vld [vmem:[#allocation7 + $0x10] sm:$0xff] }
  0x1a   :  { %v1706_v12 = vld [vmem:[#allocation7 + $0x8] sm:$0xff]  ;;  %v1705_v13 = vld [vmem:[#allocation7] sm:$0xff]  ;;  %v1715_v14 = vld [vmem:[#allocation7 + $0x10] sm:$0xff] }
  0x1b   :  { %v1714_v15 = vld [vmem:[#allocation7 + $0x8] sm:$0xff]  ;;  %v1713_v16 = vld [vmem:[#allocation7] sm:$0xff]  ;;  %v1728_v17 = vld [vmem:[#allocation7 + $0x38] sm:$0xff] }
  0x1c   :  { %180 = vmatpush.bf16.msra.mxu0 %v1711_v2  ;;  %348 = vmatpush.bf16.msra.mxu2 %v1728_v17  ;;  %v1727_v18 = vld [vmem:[#allocation7 + $0x30] sm:$0xff]  ;;  %v1726_v19 = vld [vmem:[#allocation7 + $0x28] sm:$0xff]  ;;  %v1725_v20 = vld [vmem:[#allocation7 + $0x20] sm:$0xff] }
  0x1d   :  { %264 = vmatpush.bf16.msra.mxu1 %v1719_v4  ;;  %v113_v21 = vld [vmem:[#allocation4] sm:$0xff]   ;;  %v1724_v22 = vld [vmem:[#allocation7 + $0x18] sm:$0xff]  ;;  %v1723_v29 = vld [vmem:[#allocation7 + $0x10] sm:$0xff] }
  0x1e   :  { %v114_v23 = vunpack.c.l.bf16 %v113_v21  ;;  %v1722_v30 = vld [vmem:[#allocation7 + $0x8] sm:$0xff]  ;;  %v1721_v31 = vld [vmem:[#allocation7] sm:$0xff]  ;;  %v1736_v32 = vld [vmem:[#allocation7 + $0x38] sm:$0xff]  ;;  %v198_v37 = vunpack.c.h.bf16 %v113_v21 }
  0x1f   :  { %433 = vmatpush.bf16.msra.mxu3 %v1736_v32  ;;  %v1735_v33 = vld [vmem:[#allocation7 + $0x30] sm:$0xff]  ;;  %v1734_v34 = vld [vmem:[#allocation7 + $0x28] sm:$0xff]  ;;  %v1733_v35 = vld [vmem:[#allocation7 + $0x20] sm:$0xff] }
  0x20   :  { %181 = vmatpush.bf16.msra.mxu0 %v1710_v5  ;;  %349 = vmatpush.bf16.msra.mxu2 %v1727_v18  ;;  %v1732_v36 = vld [vmem:[#allocation7 + $0x18] sm:$0xff]  ;;  %v1731_v43 = vld [vmem:[#allocation7 + $0x10] sm:$0xff]  ;;  %v1730_v44 = vld [vmem:[#allocation7 + $0x8] sm:$0xff] }
  0x21   :  { %265 = vmatpush.bf16.msra.mxu1 %v1718_v6  ;;  %v1729_v45 = vld [vmem:[#allocation7] sm:$0xff]  ;;  %v1744_v46 = vld [vmem:[#allocation7 + $0x38] sm:$0xff]  ;;  %v1743_v47 = vld [vmem:[#allocation7 + $0x30] sm:$0xff] }
  0x22   :  { %v1742_v48 = vld [vmem:[#allocation7 + $0x28] sm:$0xff]  ;;  %v1741_v49 = vld [vmem:[#allocation7 + $0x20] sm:$0xff]  ;;  %v1740_v51 = vld [vmem:[#allocation7 + $0x18] sm:$0xff] }
  0x23   :  { %434 = vmatpush.bf16.msra.mxu3 %v1735_v33  ;;  %v282_v50 = vld [vmem:[#allocation4 + $0x8] sm:$0xff]   ;;  %v1739_v53 = vld [vmem:[#allocation7 + $0x10] sm:$0xff]  ;;  %v1737_v57 = vld [vmem:[#allocation7] sm:$0xff] }
  0x24   :  { %182 = vmatpush.bf16.msra.mxu0 %v1709_v7  ;;  %350 = vmatpush.bf16.msra.mxu2 %v1726_v19  ;;  %v283_v52 = vunpack.c.l.bf16 %v282_v50  ;;  %v1738_v56 = vld [vmem:[#allocation7 + $0x8] sm:$0xff]  ;;  %v1780_v58 = vld [vmem:[#allocation9 + $0x38] sm:$0xff]  ;;  %v1779_v62 = vld [vmem:[#allocation9 + $0x30] sm:$0xff]  ;;  %v368_v6 = vunpack.c.h.bf16 %v282_v50 }
  0x25   :  { %266 = vmatpush.bf16.msra.mxu1 %v1717_v8  ;;  %v1778_v63 = vld [vmem:[#allocation9 + $0x28] sm:$0xff]  ;;  %v1777_v1 = vld [vmem:[#allocation9 + $0x20] sm:$0xff]  ;;  %v1776_v2 = vld [vmem:[#allocation9 + $0x18] sm:$0xff] }
  0x26   :  { %v1775_v3 = vld [vmem:[#allocation9 + $0x10] sm:$0xff]  ;;  %v1774_v4 = vld [vmem:[#allocation9 + $0x8] sm:$0xff]  ;;  %v1773_v5 = vld [vmem:[#allocation9] sm:$0xff] }
  0x27   :  { %435 = vmatpush.bf16.msra.mxu3 %v1734_v34  ;;  %v1748_v18 = vld [vmem:[#allocation7 + $0x18] sm:$0xff]  ;;  %v1747_v19 = vld [vmem:[#allocation7 + $0x10] sm:$0xff]  ;;  %v1745_v21 = vld [vmem:[#allocation7] sm:$0xff] }
  0x28   :  { %183 = vmatpush.bf16.msra.mxu0 %v1708_v9  ;;  %351 = vmatpush.bf16.msra.mxu2 %v1725_v20  ;;  %v1746_v20 = vld [vmem:[#allocation7 + $0x8] sm:$0xff] }
  0x29   :  { %267 = vmatpush.bf16.msra.mxu1 %v1716_v10 }
  0x2b   :  { %436 = vmatpush.bf16.msra.mxu3 %v1733_v35 }
  0x2c   :  { %184 = vmatpush.bf16.msra.mxu0 %v1707_v11  ;;  %352 = vmatpush.bf16.msra.mxu2 %v1724_v22 }
  0x2d   :  { %268 = vmatpush.bf16.msra.mxu1 %v1715_v14  ;;  %v2095_v14 = vld [vmem:[#allocation10 + $0x38] sm:$0xff] }
  0x2f   :  { %437 = vmatpush.bf16.msra.mxu3 %v1732_v36 }
  0x30   :  { %185 = vmatpush.bf16.msra.mxu0 %v1706_v12  ;;  %353 = vmatpush.bf16.msra.mxu2 %v1723_v29  ;;  %v1752_v12 = vld [vmem:[#allocation7 + $0x38] sm:$0xff]  ;;  %v2123_v29 = vld [vmem:[#allocation10] sm:$0xff] }
  0x31   :  { %269 = vmatpush.bf16.msra.mxu1 %v1714_v15  ;;  %v1750_v15 = vld [vmem:[#allocation7 + $0x28] sm:$0xff] }
  0x33   :  { %438 = vmatpush.bf16.msra.mxu3 %v1731_v43 }
  0x34   :  { %186 = vmatpush.bf16.msra.mxu0 %v1705_v13  ;;  %354 = vmatpush.bf16.msra.mxu2 %v1722_v30  ;;  %v1751_v13 = vld [vmem:[#allocation7 + $0x30] sm:$0xff] }
  0x35   :  { %270 = vmatpush.bf16.msra.mxu1 %v1713_v16  ;;  %v1749_v16 = vld [vmem:[#allocation7 + $0x20] sm:$0xff]  ;;  %v2127_v30 = vld [vmem:[#allocation4 + $0x10] sm:$0xff]  }
  0x37   :  { %187 = vmatmul.bf16.vlgmr.msra.gmra.mxu0 %v2029_v0  ;;  %439 = vmatpush.bf16.msra.mxu3 %v1730_v44  ;;  %v1758_v44 = vld [vmem:[#allocation7 + $0x28] sm:$0xff] }
  0x38   :  { %355 = vmatpush.bf16.msra.mxu2 %v1721_v31  ;;  %518 = vmatpush.bf16.msrb.mxu0 %v1744_v46  ;;  %v453_v31 = vunpack.c.l.bf16 %v2127_v30 }
  0x39   :  { %603 = vmatpush.bf16.msrb.mxu1 %v1752_v12  ;;  %v1762_v12 = vld [vmem:[#allocation7 + $0x8] sm:$0xff] }
  0x3b   :  { %440 = vmatpush.bf16.msra.mxu3 %v1729_v45  ;;  %v1757_v45 = vld [vmem:[#allocation7 + $0x20] sm:$0xff] }
  0x3c   :  { %519 = vmatpush.bf16.msrb.mxu0 %v1743_v47 }
  0x3d   :  { %604 = vmatpush.bf16.msrb.mxu1 %v1751_v13 }
  0x40   :  { %520 = vmatpush.bf16.msrb.mxu0 %v1742_v48  ;;  %v1756_v48 = vld [vmem:[#allocation7 + $0x18] sm:$0xff] }
  0x41   :  { %605 = vmatpush.bf16.msrb.mxu1 %v1750_v15 }
  0x44   :  { %521 = vmatpush.bf16.msrb.mxu0 %v1741_v49  ;;  %v1755_v49 = vld [vmem:[#allocation7 + $0x10] sm:$0xff] }
  0x45   :  { %606 = vmatpush.bf16.msrb.mxu1 %v1749_v16 }
  0x48   :  { %522 = vmatpush.bf16.msrb.mxu0 %v1740_v51  ;;  %v1754_v51 = vld [vmem:[#allocation7 + $0x8] sm:$0xff] }
  0x49   :  { %607 = vmatpush.bf16.msrb.mxu1 %v1748_v18  ;;  %v622_v18 = vld [vmem:[#allocation4 + $0x18] sm:$0xff]  }
  0x4c   :  { %523 = vmatpush.bf16.msrb.mxu0 %v1739_v53 }
  0x4d   :  { %608 = vmatpush.bf16.msrb.mxu1 %v1747_v19  ;;  %v623_v19 = vunpack.c.l.bf16 %v622_v18 }
  0x50   :  { %524 = vmatpush.bf16.msrb.mxu0 %v1738_v56  ;;  %v1768_v56 = vld [vmem:[#allocation7 + $0x38] sm:$0xff] }
  0x51   :  { %609 = vmatpush.bf16.msrb.mxu1 %v1746_v20  ;;  %773 = vmatpush.bf16.msrb.mxu3 %v1768_v56 }
  0x54   :  { %525 = vmatpush.bf16.msrb.mxu0 %v1737_v57 }
  0x55   :  { %610 = vmatpush.bf16.msrb.mxu1 %v1745_v21 }
  0x58   :  { %887 = vmatpush.bf16.msra.mxu0 %v1780_v58 }
  0x5c   :  { %888 = vmatpush.bf16.msra.mxu0 %v1779_v62 }
  0x60   :  { %889 = vmatpush.bf16.msra.mxu0 %v1778_v63  ;;  %v1765_v63 = vld [vmem:[#allocation7 + $0x20] sm:$0xff] }
  0x64   :  { %890 = vmatpush.bf16.msra.mxu0 %v1777_v1 }
  0x68   :  { %891 = vmatpush.bf16.msra.mxu0 %v1776_v2 }
  0x6c   :  { %892 = vmatpush.bf16.msra.mxu0 %v1775_v3 }
  0x70   :  { %893 = vmatpush.bf16.msra.mxu0 %v1774_v4  ;;  %v1764_v4 = vld [vmem:[#allocation7 + $0x18] sm:$0xff] }
  0x74   :  { %894 = vmatpush.bf16.msra.mxu0 %v1773_v5 }
  0xb4   :  { %v188_v24 = vpop.f32.mrf.mxu0 }
  0xb5   :  { %v192_v25 = vadd.f32 %v188_v24, %v114_v23  ;;  %v2099_v23 = vld [vmem:[#allocation10 + $0x30] sm:$0xff]  ;;  %v2103_v24 = vld [vmem:[#allocation10 + $0x28] sm:$0xff] }
  0xb7   :  { %1834 = vtanh.f32 %v192_v25  ;;  %v2107_v25 = vld [vmem:[#allocation10 + $0x20] sm:$0xff] }
  0xbc   :  { %v190_v26 = vpop.f32.mrf.mxu0 }
  0xbd   :  { %v1835_v27 = vpop.eup %1834  ;;  %v2111_v26 = vld [vmem:[#allocation10 + $0x18] sm:$0xff] }
  0xbe   :  { %v194_v28 = vpack.c.bf16 %v1835_v27, %v1835_v27  ;;  %v2115_v27 = vld [vmem:[#allocation10 + $0x10] sm:$0xff] }
  0xc0   :  { %195 = vst [vmem:[#allocation3] sm:$0xf] %v194_v28  ;;  %271 = vmatmul.bf16.vlgmr.msra.gmra.mxu1 %v194_v28  ;;  %v2118_v28 = vld [vmem:[#allocation10 + $0x8] sm:$0xff] }
  0xc1   :  { %999 = vmatpush.bf16.msra.mxu1 %v2095_v14 }
  0xc5   :  { %1000 = vmatpush.bf16.msra.mxu1 %v2099_v23 }
  0xc9   :  { %1001 = vmatpush.bf16.msra.mxu1 %v2103_v24 }
  0xcd   :  { %1002 = vmatpush.bf16.msra.mxu1 %v2107_v25 }
  0xd1   :  { %1003 = vmatpush.bf16.msra.mxu1 %v2111_v26 }
  0xd5   :  { %1004 = vmatpush.bf16.msra.mxu1 %v2115_v27 }
  0xd9   :  { %1005 = vmatpush.bf16.msra.mxu1 %v2118_v28 }
  0xdd   :  { %1006 = vmatpush.bf16.msra.mxu1 %v2123_v29 }
 0x13d   :  { %v272_v38 = vpop.f32.mrf.mxu1 }
 0x13e   :  { %v276_v39 = vadd.f32 %v272_v38, %v198_v37  ;;  %v109_v37 = vld [vmem:[%s2221_s1] sm:$0xff]  ;;  %v1760_v38 = vld [vmem:[#allocation7 + $0x38] sm:$0xff] }
 0x13f   :  { %vm110_vm0 = vcmp.le.s32.totalorder %v109_v37, 0  ;;  %688 = vmatpush.bf16.msrb.mxu2 %v1760_v38 }
 0x140   :  { %1836 = vtanh.f32 %v276_v39  ;;  %v1335_v39 = vadd.s32 4294967295, %v109_v37 }
 0x145   :  { %v274_v40 = vpop.f32.mrf.mxu1 }
 0x146   :  { %v1837_v41 = vpop.eup %1836  ;;  %v1759_v40 = vld [vmem:[#allocation7 + $0x30] sm:$0xff] }
 0x147   :  { %v278_v42 = vpack.c.bf16 %v1837_v41, %v1837_v41  ;;  %v2134_v41 = vsel %vm110_vm0, 7, %v1335_v39  ;;  %689 = vmatpush.bf16.msrb.mxu2 %v1759_v40 }
 0x148   :  { %vm1018_vm1 = vcmp.eq.s32.totalorder %v2134_v41, 0  ;;  %vm1045_vm2 = vcmp.eq.s32.totalorder %v2134_v41, 1  ;;  %vm1072_vm3 = vcmp.eq.s32.totalorder %v2134_v41, 2  ;;  %vm1099_vm6 = vcmp.eq.s32.totalorder %v2134_v41, 3 }
 0x149   :  { %280 = vst [vmem:[#allocation3 + $0x4] sm:$0xf] %v278_v42  ;;  %356 = vmatmul.bf16.vlgmr.msra.gmra.mxu2 %v278_v42  ;;  %v1019_v43 = vsel %vm1018_vm1, 1, %v2029_v0  ;;  %v1046_v57 = vsel %vm1045_vm2, 1, %v2029_v0  ;;  %vm1126_vm8 = vcmp.eq.s32.totalorder %v2134_v41, 4  ;;  %vm1153_vm10 = vcmp.eq.s32.totalorder %v2134_v41, 5 }
 0x14a   :  { %1021 = vperm.xlu0 %1829, %v1019_v43   ;;  %vm1180_vm12 = vcmp.eq.s32.totalorder %v2134_v41, 6  ;;  %vm1207_vm14 = vcmp.eq.s32.totalorder %v2134_v41, 7 }
 0x14b   :  { %690 = vmatpush.bf16.msrb.mxu2 %v1758_v44 }
 0x14f   :  { %691 = vmatpush.bf16.msrb.mxu2 %v1757_v45 }
 0x150   :  { %v1769_v17 = vld [vmem:[#allocation3] sm:$0xff] }
 0x152   :  { %1048 = vperm.xlu0 %1829, %v1046_v57  }
 0x153   :  { %692 = vmatpush.bf16.msrb.mxu2 %v1756_v48 }
 0x157   :  { %693 = vmatpush.bf16.msrb.mxu2 %v1755_v49 }
 0x15b   :  { %694 = vmatpush.bf16.msrb.mxu2 %v1754_v51 }
 0x1cc   :  { %v357_v54 = vpop.f32.mrf.mxu2 }
 0x1cd   :  { %v361_v55 = vadd.f32 %v357_v54, %v283_v52  ;;  %v1753_v52 = vld [vmem:[#allocation7] sm:$0xff] }
 0x1ce   :  { %695 = vmatpush.bf16.msrb.mxu2 %v1753_v52 }
 0x1cf   :  { %1838 = vtanh.f32 %v361_v55  ;;  %v538_v55 = vunpack.c.h.bf16 %v2127_v30 }
 0x1d2   :  { %1029 = vmatpush.bf16.msra.mxu2 %v2095_v14 }
 0x1d4   :  { %v359_v59 = vpop.f32.mrf.mxu2 }
 0x1d5   :  { %v1839_v60 = vpop.eup %1838  ;;  %v1767_v59 = vld [vmem:[#allocation7 + $0x30] sm:$0xff] }
 0x1d6   :  { %v363_v61 = vpack.c.bf16 %v1839_v60, %v1839_v60  ;;  %1030 = vmatpush.bf16.msra.mxu2 %v2099_v23  ;;  %774 = vmatpush.bf16.msrb.mxu3 %v1767_v59 }
 0x1d8   :  { %365 = vst [vmem:[#allocation3 + $0x8] sm:$0xf] %v363_v61  ;;  %441 = vmatmul.bf16.vlgmr.msra.gmra.mxu3 %v363_v61  ;;  %v1766_v61 = vld [vmem:[#allocation7 + $0x28] sm:$0xff] }
 0x1da   :  { %1031 = vmatpush.bf16.msra.mxu2 %v2103_v24  ;;  %775 = vmatpush.bf16.msrb.mxu3 %v1766_v61 }
 0x1de   :  { %1032 = vmatpush.bf16.msra.mxu2 %v2107_v25  ;;  %776 = vmatpush.bf16.msrb.mxu3 %v1765_v63 }
 0x1e2   :  { %1033 = vmatpush.bf16.msra.mxu2 %v2111_v26  ;;  %777 = vmatpush.bf16.msrb.mxu3 %v1764_v4 }
 0x1e6   :  { %1034 = vmatpush.bf16.msra.mxu2 %v2115_v27 }
 0x1ea   :  { %1035 = vmatpush.bf16.msra.mxu2 %v2118_v28 }
 0x1ee   :  { %1036 = vmatpush.bf16.msra.mxu2 %v2123_v29 }
 0x25b   :  { %v442_v7 = vpop.f32.mrf.mxu3 }
 0x25c   :  { %v446_v8 = vadd.f32 %v442_v7, %v368_v6  ;;  %v2169_v6 = vld [vmem:[%s2225_s5] ss:$0 sm:$0xff] }
 0x25e   :  { %1840 = vtanh.f32 %v446_v8  ;;  %v1763_v8 = vld [vmem:[#allocation7 + $0x10] sm:$0xff] }
 0x25f   :  { %778 = vmatpush.bf16.msrb.mxu3 %v1763_v8 }
 0x263   :  { %v444_v9 = vpop.f32.mrf.mxu3  ;;  %779 = vmatpush.bf16.msrb.mxu3 %v1762_v12 }
 0x264   :  { %v1841_v10 = vpop.eup %1840 }
 0x265   :  { %v448_v11 = vpack.c.bf16 %v1841_v10, %v1841_v10 }
 0x267   :  { %450 = vst [vmem:[#allocation3 + $0xc] sm:$0xf] %v448_v11  ;;  %526 = vmatmul.bf16.vlgmr.msrb.gmra.mxu0 %v448_v11 }
 0x268   :  { %1164 = vmatpush.bf16.msrb.mxu0 %v2095_v14 }
 0x26c   :  { %1165 = vmatpush.bf16.msrb.mxu0 %v2099_v23 }
 0x26e   :  { %v1770_v22 = vld [vmem:[#allocation3 + $0x8] sm:$0xff] }
 0x270   :  { %1166 = vmatpush.bf16.msrb.mxu0 %v2103_v24 }
 0x274   :  { %1167 = vmatpush.bf16.msrb.mxu0 %v2107_v25 }
 0x277   :  { %895 = vmatmul.bf16.vlgmr.msra.gmra.mxu0 %v1769_v17  ;;  %v1761_v17 = vld [vmem:[#allocation7] sm:$0xff] }
 0x278   :  { %1168 = vmatpush.bf16.msrb.mxu0 %v2111_v26  ;;  %780 = vmatpush.bf16.msrb.mxu3 %v1761_v17 }
 0x27c   :  { %1169 = vmatpush.bf16.msrb.mxu0 %v2115_v27  ;;  %1056 = vmatpush.bf16.msra.mxu3 %v2095_v14 }
 0x280   :  { %1170 = vmatpush.bf16.msrb.mxu0 %v2118_v28  ;;  %1057 = vmatpush.bf16.msra.mxu3 %v2099_v23 }
 0x284   :  { %1171 = vmatpush.bf16.msrb.mxu0 %v2123_v29  ;;  %1058 = vmatpush.bf16.msra.mxu3 %v2103_v24 }
 0x287   :  { %900 = vmatmul.bf16.gmra.mxu0 %v1770_v22  ;;  %v1073_v22 = vsel %vm1072_vm3, 1, %v2029_v0 }
 0x288   :  { %1059 = vmatpush.bf16.msra.mxu3 %v2107_v25  ;;  %1075 = vperm.xlu1 %1830, %v1073_v22  }
 0x28c   :  { %1060 = vmatpush.bf16.msra.mxu3 %v2111_v26 }
 0x290   :  { %1061 = vmatpush.bf16.msra.mxu3 %v2115_v27 }
 0x294   :  { %1062 = vmatpush.bf16.msra.mxu3 %v2118_v28 }
 0x298   :  { %1063 = vmatpush.bf16.msra.mxu3 %v2123_v29 }
 0x2e4   :  { %v527_v32 = vpop.f32.mrf.mxu0 }
 0x2e5   :  { %v531_v33 = vadd.f32 %v527_v32, %v453_v31 }
 0x2e7   :  { %1842 = vtanh.f32 %v531_v33 }
 0x2ec   :  { %v529_v34 = vpop.f32.mrf.mxu0 }
 0x2ed   :  { %v1843_v35 = vpop.eup %1842 }
 0x2ee   :  { %v533_v36 = vpack.c.bf16 %v1843_v35, %v1843_v35 }
 0x2f0   :  { %535 = vst [vmem:[#allocation3 + $0x10] sm:$0xf] %v533_v36  ;;  %611 = vmatmul.bf16.vlgmr.msrb.gmra.mxu1 %v533_v36  ;;  %v1022_v36 = vpop.permute.xlu0 %1021 }
 0x2f1   :  { %1083 = vmatpush.bf16.msrb.mxu1 %v2095_v14  ;;  %vm1023_vm4 = vcmp.eq.s32.totalorder %v1022_v36, 1 }
 0x2f4   :  { %v896_v42 = vpop.f32.mrf.mxu0 }
 0x2f5   :  { %1084 = vmatpush.bf16.msrb.mxu1 %v2099_v23 }
 0x2f9   :  { %1085 = vmatpush.bf16.msrb.mxu1 %v2103_v24 }
 0x2fc   :  { %v898_v46 = vpop.f32.mrf.mxu0 }
 0x2fd   :  { %v1800_v47 = vpack.c.bf16 %v898_v46, %v896_v42  ;;  %1086 = vmatpush.bf16.msrb.mxu1 %v2107_v25  ;;  %v1049_v42 = vpop.permute.xlu0 %1048 }
 0x2fe   :  { %vm1050_vm5 = vcmp.eq.s32.totalorder %v1049_v42, 1  ;;  %v1794_v42 = vld [vmem:[#allocation12 + $0x28] sm:$0xff] }
 0x2ff   :  { %1801 = vst [vmem:[#allocation2] sm:$0xff] %v1800_v47  }
 0x300   :  { %1007 = vmatmul.bf16.vlgmr.msra.gmra.mxu1 %v2029_v0 }
 0x301   :  { %1087 = vmatpush.bf16.msrb.mxu1 %v2111_v26 }
 0x304   :  { %v901_v50 = vpop.f32.mrf.mxu0 }
 0x305   :  { %1088 = vmatpush.bf16.msrb.mxu1 %v2115_v27 }
 0x306   :  { %v933_v3 = vld [vmem:[#allocation2] sm:$0xff]  }
 0x307   :  { %v934_v5 = vunpack.c.l.bf16 %v933_v3  ;;  %v1028_v37 = vunpack.c.h.bf16 %v933_v3 }
 0x309   :  { %1089 = vmatpush.bf16.msrb.mxu1 %v2118_v28 }
 0x30c   :  { %v903_v53 = vpop.f32.mrf.mxu0 }
 0x30d   :  { %v1805_v54 = vpack.c.bf16 %v903_v53, %v901_v50  ;;  %1090 = vmatpush.bf16.msrb.mxu1 %v2123_v29  ;;  %v1076_v53 = vpop.permute.xlu1 %1075 }
 0x30e   :  { %vm1077_vm7 = vcmp.eq.s32.totalorder %v1076_v53, 1 }
 0x30f   :  { %1817 = vst [vmem:[#allocation2 + $0x8] sm:$0xff] %v1805_v54  }
 0x311   :  { %1191 = vmatpush.bf16.msra.mxu1 %v2095_v14 }
 0x315   :  { %1192 = vmatpush.bf16.msra.mxu1 %v2099_v23 }
 0x316   :  { %v1054_v50 = vld [vmem:[#allocation2 + $0x8] sm:$0xff]  }
 0x317   :  { %v1055_v51 = vunpack.c.l.bf16 %v1054_v50 }
 0x319   :  { %1193 = vmatpush.bf16.msra.mxu1 %v2103_v24 }
 0x31d   :  { %1194 = vmatpush.bf16.msra.mxu1 %v2107_v25 }
 0x321   :  { %1195 = vmatpush.bf16.msra.mxu1 %v2111_v26 }
 0x325   :  { %1196 = vmatpush.bf16.msra.mxu1 %v2115_v27 }
 0x329   :  { %1197 = vmatpush.bf16.msra.mxu1 %v2118_v28 }
 0x32d   :  { %1198 = vmatpush.bf16.msra.mxu1 %v2123_v29 }
 0x36d   :  { %v612_v58 = vpop.f32.mrf.mxu1 }
 0x36e   :  { %v616_v60 = vadd.f32 %v612_v58, %v538_v55  ;;  %v1127_v58 = vsel %vm1126_vm8, 1, %v2029_v0 }
 0x36f   :  { %1129 = vperm.xlu2 %1831, %v1127_v58  }
 0x370   :  { %1844 = vtanh.f32 %v616_v60 }
 0x375   :  { %v614_v62 = vpop.f32.mrf.mxu1 }
 0x376   :  { %v1845_v1 = vpop.eup %1844  ;;  %v1082_v62 = vunpack.c.h.bf16 %v1054_v50  ;;  %v1789_v50 = vld [vmem:[#allocation12] sm:$0xff] }
 0x377   :  { %v618_v2 = vpack.c.bf16 %v1845_v1, %v1845_v1 }
 0x379   :  { %620 = vst [vmem:[#allocation3 + $0x14] sm:$0xf] %v618_v2  ;;  %696 = vmatmul.bf16.vlgmr.msrb.gmra.mxu2 %v618_v2 }
 0x37a   :  { %1110 = vmatpush.bf16.msrb.mxu2 %v2095_v14 }
 0x37d   :  { %v1008_v7 = vpop.f32.mrf.mxu1 }
 0x37e   :  { %v1012_v9 = vadd.f32 %v1008_v7, %v934_v5  ;;  %1111 = vmatpush.bf16.msrb.mxu2 %v2099_v23 }
 0x380   :  { %v1016_v10 = vadd.f32 %v2169_v6, %v1012_v9  ;;  %v1771_v11 = vld [vmem:[#allocation3 + $0x10] sm:$0xff]  ;;  %v1154_v9 = vsel %vm1153_vm10, 1, %v2029_v0 }
 0x381   :  { %905 = vmatmul.bf16.gmra.mxu0 %v1771_v11  ;;  %1156 = vperm.xlu2 %1831, %v1154_v9  }
 0x382   :  { %1846 = vtanh.f32 %v1016_v10  ;;  %1112 = vmatpush.bf16.msrb.mxu2 %v2103_v24 }
 0x385   :  { %v1010_v13 = vpop.f32.mrf.mxu1 }
 0x386   :  { %1113 = vmatpush.bf16.msrb.mxu2 %v2107_v25 }
 0x388   :  { %v1847_v15 = vpop.eup %1846 }
 0x389   :  { %v1025_v16 = vpack.c.bf16 %v1847_v15, %v1847_v15 }
 0x38a   :  { %1114 = vmatpush.bf16.msrb.mxu2 %v2111_v26 }
 0x38b   :  { %1037 = vmatmul.bf16.vlgmr.msra.gmra.mxu2 %v1025_v16 }
 0x38e   :  { %1115 = vmatpush.bf16.msrb.mxu2 %v2115_v27 }
 0x392   :  { %1116 = vmatpush.bf16.msrb.mxu2 %v2118_v28 }
 0x396   :  { %1117 = vmatpush.bf16.msrb.mxu2 %v2123_v29 }
 0x3c9   :  { %v1130_v16 = vpop.permute.xlu2 %1129 }
 0x3ca   :  { %vm1131_vm11 = vcmp.eq.s32.totalorder %v1130_v16, 1 }
 0x3fc   :  { %v697_v20 = vpop.f32.mrf.mxu2 }
 0x3fd   :  { %v701_v21 = vadd.f32 %v697_v20, %v623_v19 }
 0x3fe   :  { %v906_v30 = vpop.f32.mrf.mxu0 }
 0x3ff   :  { %1848 = vtanh.f32 %v701_v21  ;;  %v1181_v21 = vsel %vm1180_vm12, 1, %v2029_v0 }
 0x400   :  { %1183 = vperm.xlu0 %1829, %v1181_v21  }
 0x404   :  { %v699_v31 = vpop.f32.mrf.mxu2 }
 0x405   :  { %v1849_v32 = vpop.eup %1848 }
 0x406   :  { %v703_v33 = vpack.c.bf16 %v1849_v32, %v1849_v32  ;;  %v908_v34 = vpop.f32.mrf.mxu0 }
 0x407   :  { %v1810_v35 = vpack.c.bf16 %v908_v34, %v906_v30 }
 0x408   :  { %705 = vst [vmem:[#allocation3 + $0x18] sm:$0xf] %v703_v33  ;;  %781 = vmatmul.bf16.vlgmr.msrb.gmra.mxu3 %v703_v33  ;;  %v1157_v33 = vpop.permute.xlu2 %1156 }
 0x409   :  { %1137 = vmatpush.bf16.msrb.mxu3 %v2095_v14  ;;  %1818 = vst [vmem:[#allocation2 + $0x10] sm:$0xff] %v1810_v35   ;;  %v1024_v14 = vsel %vm1023_vm4, %v1847_v15, 0.0  ;;  %vm1158_vm13 = vcmp.eq.s32.totalorder %v1157_v33, 1 }
 0x40d   :  { %1138 = vmatpush.bf16.msrb.mxu3 %v2099_v23  ;;  %v708_v23 = vunpack.c.h.bf16 %v622_v18 }
 0x40e   :  { %v1038_v38 = vpop.f32.mrf.mxu2 }
 0x40f   :  { %v1042_v39 = vadd.f32 %v1038_v38, %v1028_v37  ;;  %v1796_v38 = vld [vmem:[#allocation12 + $0x38] sm:$0xff] }
 0x410   :  { %v1108_v10 = vld [vmem:[#allocation2 + $0x10] sm:$0xff]   ;;  %1283 = vmatpush.bf16.msra.mxu2 %v1796_v38 }
 0x411   :  { %v1043_v40 = vadd.f32 %v2169_v6, %v1042_v39  ;;  %1139 = vmatpush.bf16.msrb.mxu3 %v2103_v24  ;;  %v1109_v11 = vunpack.c.l.bf16 %v1108_v10  ;;  %v1136_v22 = vunpack.c.h.bf16 %v1108_v10  ;;  %v1208_v39 = vsel %vm1207_vm14, 1, %v2029_v0 }
 0x413   :  { %1850 = vtanh.f32 %v1043_v40  ;;  %v1795_v40 = vld [vmem:[#allocation12 + $0x30] sm:$0xff] }
 0x414   :  { %1284 = vmatpush.bf16.msra.mxu2 %v1795_v40 }
 0x415   :  { %1140 = vmatpush.bf16.msrb.mxu3 %v2107_v25  ;;  %v1100_v25 = vsel %vm1099_vm6, 1, %v2029_v0  ;;  %v1793_v0 = vld [vmem:[#allocation12 + $0x20] sm:$0xff] }
 0x416   :  { %v1040_v43 = vpop.f32.mrf.mxu2  ;;  %1102 = vperm.xlu1 %1830, %v1100_v25  }
 0x418   :  { %1285 = vmatpush.bf16.msra.mxu2 %v1794_v42 }
 0x419   :  { %v1851_v44 = vpop.eup %1850  ;;  %1141 = vmatpush.bf16.msrb.mxu3 %v2111_v26 }
 0x41a   :  { %v1051_v45 = vsel %vm1050_vm5, %v1851_v44, %v1024_v14  ;;  %v1052_v46 = vpack.c.bf16 %v1851_v44, %v1851_v44 }
 0x41c   :  { %1064 = vmatmul.bf16.vlgmr.msra.gmra.mxu3 %v1052_v46  ;;  %1286 = vmatpush.bf16.msra.mxu2 %v1793_v0 }
 0x41d   :  { %1142 = vmatpush.bf16.msrb.mxu3 %v2115_v27 }
 0x41e   :  { %1210 = vperm.xlu1 %1830, %v1208_v39  }
 0x421   :  { %1143 = vmatpush.bf16.msrb.mxu3 %v2118_v28 }
 0x425   :  { %1144 = vmatpush.bf16.msrb.mxu3 %v2123_v29 }
 0x488   :  { %v1103_v3 = vpop.permute.xlu1 %1102 }
 0x489   :  { %vm1104_vm9 = vcmp.eq.s32.totalorder %v1103_v3, 1 }
 0x48b   :  { %v782_v24 = vpop.f32.mrf.mxu3 }
 0x48c   :  { %v786_v47 = vadd.f32 %v782_v24, %v708_v23  ;;  %v1184_v23 = vpop.permute.xlu0 %1183 }
 0x48d   :  { %vm1185_vm15 = vcmp.eq.s32.totalorder %v1184_v23, 1 }
 0x48e   :  { %1852 = vtanh.f32 %v786_v47 }
 0x493   :  { %v784_v48 = vpop.f32.mrf.mxu3 }
 0x494   :  { %v1853_v26 = vpop.eup %1852  ;;  %v1792_v48 = vld [vmem:[#allocation12 + $0x18] sm:$0xff] }
 0x495   :  { %v788_v49 = vpack.c.bf16 %v1853_v26, %v1853_v26  ;;  %1287 = vmatpush.bf16.msra.mxu2 %v1792_v48  ;;  %v1791_v26 = vld [vmem:[#allocation12 + $0x10] sm:$0xff] }
 0x497   :  { %790 = vst [vmem:[#allocation3 + $0x1c] sm:$0xf] %v788_v49  ;;  %v1790_v49 = vld [vmem:[#allocation12 + $0x8] sm:$0xff] }
 0x499   :  { %1288 = vmatpush.bf16.msra.mxu2 %v1791_v26 }
 0x49d   :  { %1289 = vmatpush.bf16.msra.mxu2 %v1790_v49 }
 0x49e   :  { %v1772_v27 = vld [vmem:[#allocation3 + $0x18] sm:$0xff] }
 0x49f   :  { %v1065_v52 = vpop.f32.mrf.mxu3  ;;  %910 = vmatmul.bf16.gmra.mxu0 %v1772_v27 }
 0x4a0   :  { %v1069_v28 = vadd.f32 %v1065_v52, %v1055_v51 }
 0x4a1   :  { %1290 = vmatpush.bf16.msra.mxu2 %v1789_v50 }
 0x4a2   :  { %v1070_v29 = vadd.f32 %v2169_v6, %v1069_v28 }
 0x4a4   :  { %1854 = vtanh.f32 %v1070_v29  ;;  %v1211_v29 = vpop.permute.xlu1 %1210 }
 0x4a5   :  { %vm1212_vm0 = vcmp.eq.s32.totalorder %v1211_v29, 1 }
 0x4a7   :  { %v1067_v54 = vpop.f32.mrf.mxu3 }
 0x4aa   :  { %v1855_v55 = vpop.eup %1854 }
 0x4ab   :  { %v1078_v56 = vsel %vm1077_vm7, %v1855_v55, %v1051_v45  ;;  %v1079_v57 = vpack.c.bf16 %v1855_v55, %v1855_v55 }
 0x4ad   :  { %1091 = vmatmul.bf16.vlgmr.msrb.gmra.mxu1 %v1079_v57  ;;  %v1833_v57 = vld [vmem:[%s2227_s7] ss:$0 sm:$0xff]  ;;  %s1323_s7 = sshll.u32 %s2228_s8, 4  ;;  %s1324_s7 = int_to_ptr.hbm [resolvable:$true] %s1323_s7 }
 0x51c   :  { %v911_v59 = vpop.f32.mrf.mxu0 }
 0x524   :  { %v913_v60 = vpop.f32.mrf.mxu0 }
 0x525   :  { %v1815_v61 = vpack.c.bf16 %v913_v60, %v911_v59 }
 0x527   :  { %1819 = vst [vmem:[#allocation2 + $0x18] sm:$0xff] %v1815_v61  }
 0x52a   :  { %v1092_v63 = vpop.f32.mrf.mxu1 }
 0x52b   :  { %v1096_v1 = vadd.f32 %v1092_v63, %v1082_v62 }
 0x52d   :  { %v1097_v2 = vadd.f32 %v2169_v6, %v1096_v1 }
 0x52e   :  { %v1162_v43 = vld [vmem:[#allocation2 + $0x18] sm:$0xff]  }
 0x52f   :  { %1856 = vtanh.f32 %v1097_v2  ;;  %v1163_v44 = vunpack.c.l.bf16 %v1162_v43  ;;  %v1190_v51 = vunpack.c.h.bf16 %v1162_v43 }
 0x532   :  { %v1094_v4 = vpop.f32.mrf.mxu1 }
 0x535   :  { %v1857_v5 = vpop.eup %1856 }
 0x536   :  { %v1105_v7 = vsel %vm1104_vm9, %v1857_v5, %v1078_v56  ;;  %v1106_v8 = vpack.c.bf16 %v1857_v5, %v1857_v5 }
 0x538   :  { %1118 = vmatmul.bf16.vlgmr.msrb.gmra.mxu2 %v1106_v8 }
 0x5bb   :  { %v1119_v12 = vpop.f32.mrf.mxu2 }
 0x5bc   :  { %v1123_v13 = vadd.f32 %v1119_v12, %v1109_v11 }
 0x5be   :  { %v1124_v15 = vadd.f32 %v2169_v6, %v1123_v13 }
 0x5c0   :  { %1858 = vtanh.f32 %v1124_v15 }
 0x5c3   :  { %v1121_v17 = vpop.f32.mrf.mxu2 }
 0x5c6   :  { %v1859_v18 = vpop.eup %1858 }
 0x5c7   :  { %v1132_v19 = vsel %vm1131_vm11, %v1859_v18, %v1105_v7  ;;  %v1133_v20 = vpack.c.bf16 %v1859_v18, %v1859_v18 }
 0x5c9   :  { %1145 = vmatmul.bf16.vlgmr.msrb.gmra.mxu3 %v1133_v20 }
 0x64c   :  { %v1146_v30 = vpop.f32.mrf.mxu3 }
 0x64d   :  { %v1150_v31 = vadd.f32 %v1146_v30, %v1136_v22 }
 0x64f   :  { %v1151_v32 = vadd.f32 %v2169_v6, %v1150_v31 }
 0x651   :  { %1860 = vtanh.f32 %v1151_v32 }
 0x654   :  { %v1148_v34 = vpop.f32.mrf.mxu3 }
 0x657   :  { %v1861_v35 = vpop.eup %1860 }
 0x658   :  { %v1159_v36 = vsel %vm1158_vm13, %v1861_v35, %v1132_v19  ;;  %v1160_v37 = vpack.c.bf16 %v1861_v35, %v1861_v35 }
 0x65a   :  { %1172 = vmatmul.bf16.vlgmr.msrb.gmra.mxu0 %v1160_v37 }
 0x6d7   :  { %v1173_v14 = vpop.f32.mrf.mxu0 }
 0x6d8   :  { %v1177_v45 = vadd.f32 %v1173_v14, %v1163_v44 }
 0x6da   :  { %v1178_v46 = vadd.f32 %v2169_v6, %v1177_v45 }
 0x6dc   :  { %1862 = vtanh.f32 %v1178_v46 }
 0x6df   :  { %v1175_v24 = vpop.f32.mrf.mxu0 }
 0x6e2   :  { %v1863_v41 = vpop.eup %1862 }
 0x6e3   :  { %v1186_v47 = vsel %vm1185_vm15, %v1863_v41, %v1159_v36  ;;  %v1187_v25 = vpack.c.bf16 %v1863_v41, %v1863_v41 }
 0x6e5   :  { %1199 = vmatmul.bf16.vlgmr.msra.gmra.mxu1 %v1187_v25 }
 0x762   :  { %v1200_v27 = vpop.f32.mrf.mxu1 }
 0x763   :  { %v1204_v52 = vadd.f32 %v1200_v27, %v1190_v51 }
 0x765   :  { %v1205_v28 = vadd.f32 %v2169_v6, %v1204_v52 }
 0x767   :  { %1864 = vtanh.f32 %v1205_v28 }
 0x76a   :  { %v1202_v53 = vpop.f32.mrf.mxu1 }
 0x76d   :  { %v1865_v54 = vpop.eup %1864 }
 0x76e   :  { %v1213_v55 = vsel %vm1212_vm0, %v1865_v54, %v1186_v47 }
 0x76f   :  { %v1214_v56 = vpack.c.bf16 %v1213_v55, %v1213_v55 }
 0x771   :  { %1291 = vmatmul.bf16.vlgmr.msra.gmra.mxu2 %v1214_v56 }
 0x7f4   :  { %v1292_v58 = vpop.f32.mrf.mxu2 }
 0x7f5   :  { %v1293_v59 = vadd.f32 %v1833_v57, %v1292_v58 }
 0x7f7   :  { %v1704_v60 = vmul.f32 -1.442695, %v1293_v59 }
 0x7f9   :  { %1866 = vpow2.f32 %v1704_v60 }
 0x7fc   :  { %v1294_v61 = vpop.f32.mrf.mxu2 }
 0x7ff   :  { %v1867_v62 = vpop.eup %1866 }
 0x800   :  { %v1299_v63 = vadd.f32 1.0, %v1867_v62 }
 0x802   :  { %1868 = vrcp.f32 %v1299_v63  ;;  %v1311_v3 = vand.u32 2147483648, %v1299_v63  ;;  %v1309_v5 = vand.u32 2147483647, %v1299_v63  ;;  %vm1305_vm2 = vweird.f32 %v1299_v63 }
 0x804   :  { %v1312_v8 = vor.u32 1.1754944e-38, %v1311_v3  ;;  %vm1310_vm4 = vcmp.eq.f32.partialorder %v1309_v5, 8.507059e+37 }
 0x808   :  { %v1869_v6 = vpop.eup %1868 }
 0x809   :  { %v1301_v1 = vmul.f32 %v1869_v6, %v1299_v63  ;;  %vm1306_vm1 = vweird.f32 %v1869_v6 }
 0x80a   :  { %vm1307_vm3 = vmor %vm1305_vm2, %vm1306_vm1 }
 0x80b   :  { %v1302_v2 = vsub.f32 1.0, %v1301_v1 }
 0x80d   :  { %v1303_v4 = vmul.f32 %v1869_v6, %v1302_v2 }
 0x80f   :  { %v1304_v7 = vadd.f32 %v1869_v6, %v1303_v4 }
 0x811   :  { %v1308_v9 = vsel %vm1307_vm3, %v1869_v6, %v1304_v7 }
 0x812   :  { %v1313_v10 = vsel %vm1310_vm4, %v1312_v8, %v1308_v9 }
 0x813   :  { %1315 = vst [vmem:[#allocation13] sm:$0xff] %v1313_v10 }
 0x814   :  { %1326 = dma.vmem_to_hbm [thread:$0]  %s1322_s10, 128, %s1324_s7, [#allocation6]  }
 0x815   :  { %2020 = dma.done.wait [#allocation6], 128  }
 0x816   :  { %2021 = vsyncadd [#allocation6], 4294967168 }
 0x817   :  { %1331 = vsyncpa [#allocation5], 1 }
 0x818   :  { %1332 = vsyncpa [#allocation8], 1 }
 0x819   :  { %1333 = vsyncpa [#allocation11], 1 }
 0x81a   :  { %1334 = vsyncpa [#allocation6], 1 }

</bundles_post_ra>
